<compile_context>
chip_gen: v6e
topology: v6e:2x2x1
jax: 0.10.0
libtpu: 0.0.40
codegen_flags: <defaults>
</compile_context>

<pallas_src>
import jax
import jax.numpy as jnp
import numpy as np
from jax.experimental import pallas as pl
from jax.experimental.pallas import tpu as pltpu

C = 8          # channels after repeat == heads (dim_heads = 1)
IMSIZE = 16    # params.imsize
BATCH = 2


# ---------------------------------------------------------------------------
# Fused Pallas kernel (one grid step == one batch image)
# ---------------------------------------------------------------------------
def _branch(keys3, qrow, kmax, kmin, wl):
    # Softmax over the key axis (axis=1) of dots[a, t, l] = keys3[a, t, l] * qrow[a, l].
    # keys3 is rank-1 along the lane or leading axis, so the stable-softmax max is computed
    # algebraically (exact, incl. sign handling) instead of reducing the 3-D dots tensor.
    m = jnp.where(qrow >= 0, qrow * kmax, qrow * kmin)            # (S, L)
    ex = jnp.exp(keys3 * qrow[:, None, :] - m[:, None, :])        # (S, S, L)
    den = jnp.sum(ex, axis=1)                                     # (S, L)
    num = jnp.sum(ex * keys3, axis=1)                             # (S, L)  sum_k p * e_key
    o = num / den                                                 # per-head attn out (sv folded into wl)
    # Note: pl.reciprocal(den, approx=True) was considered but kept exact to stay well inside
    # the rtol=5e-4 validation tolerance.
    return jnp.sum(o * wl, axis=0, keepdims=True)                 # (1, L) partial Linear(S*S->1)


def axial_fused_kernel(x_ref, pos_ref, const_ref, g_ref, o_ref):
    S = x_ref.shape[0]
    L = const_ref.shape[1]
    heads = L // S

    # All 8 repeated channels are identical after the positional embedding -> keep one copy.
    e = x_ref[...] + pos_ref[...]                                 # (S, S)
    et = jnp.concatenate([e] * heads, axis=-1)                    # (S, L): [n, h*S+t] = e[n, t]

    # static row-views into the packed constant slab (zero-cost slices)
    wl_w = const_ref[0:S, :]                                      # Linear weights * sv_w, W branch
    wl_h = const_ref[S:2 * S, :]                                  # Linear weights * sv_h, H branch
    sqk_w = const_ref[2 * S:2 * S + 1, :]                         # sum(wq)*sum(wk) per lane, W
    sqk_h = const_ref[2 * S + 1:2 * S + 2, :]                     # sum(wq)*sum(wk) per lane, H
    bias = const_ref[2 * S + 2:2 * S + 3, :]                      # fully folded bias (lane-padded)

    qrow_w = et * sqk_w                                           # (S, L)
    qrow_h = et * sqk_h

    # W branch: attend along columns; leading axis = image row, key factor broadcast over lanes.
    s_w = _branch(e[:, :, None], qrow_w,
                  jnp.max(e, axis=1, keepdims=True),
                  jnp.min(e, axis=1, keepdims=True), wl_w)
    # H branch: attend along rows; leading axis = query row, key factor lives on the lane axis
    # (no transpose of e needed).
    s_h = _branch(et[None, :, :], qrow_h,
                  jnp.max(et, axis=0, keepdims=True),
                  jnp.min(et, axis=0, keepdims=True), wl_h)

    # single merged to_out + head-mix dot: (1, 2L) @ (2L, L); result is lane-dense (128 lanes)
    s = jnp.concatenate([s_w, s_h], axis=-1)
    out = jnp.dot(s, g_ref[...], preferred_element_type=jnp.float32) + bias   # (1, L)
    o_ref[...] = out[None]                                        # (1, 1, L) lane-dense store


# ---------------------------------------------------------------------------
# Wrapper: derive lane-packed weight slabs (parameter-only, tiny) and launch one kernel
# ---------------------------------------------------------------------------
@jax.jit
def axial_forward(x, params):
    B, _, S, _ = x.shape
    L = C * S                                                     # packed lane width (= 128 here)
    x_flat = x.reshape(B * S, S).astype(jnp.float32)              # channel dim is 1 -> free reshape

    wq_h, wk_h, wv_h, wo_h, bo_h = params["attn_h"]
    wq_w, wk_w, wv_w, wo_w, bo_w = params["attn_w"]
    w_lin, b_lin = params["w_lin"], params["b_lin"]

    # exact channel collapse (all repeated channels identical): q/k/v reduce to row sums
    sqk_w = jnp.repeat(wq_w.sum(1) * wk_w.sum(1), S)[None, :]     # (1, L) lane h*S+t -> sqk[h]
    sqk_h = jnp.repeat(wq_h.sum(1) * wk_h.sum(1), S)[None, :]
    sv_w = jnp.repeat(wv_w.sum(1), S)[None, :]
    sv_h = jnp.repeat(wv_h.sum(1), S)[None, :]

    # Linear(S*S -> 1) weights laid out per lane (h, j), with the to_v scale folded in (exact)
    w2 = w_lin.reshape(S, S)
    wl_base = jnp.tile(w2, (1, C))                                # [i, h*S+j] = w_lin[i*S+j]
    wl_w = wl_base * sv_w
    wl_h = wl_base * sv_h

    # bias terms fold into a single per-channel constant, zero-padded to the lane width
    bias_c = (bo_w + bo_h) * jnp.sum(w_lin) + b_lin[0, 0]         # (1, C)
    bias_pad = jnp.pad(bias_c, ((0, 0), (0, L - C)))              # (1, L)

    const_slab = jnp.concatenate([wl_w, wl_h, sqk_w, sqk_h, bias_pad], axis=0)   # (2S+3, L)

    # to_out head mix for both branches stacked for one MXU dot, zero-padded to lane-dense N=L
    g_w = jnp.repeat(wo_w.T, S, axis=0)                           # (L, C): [h*S+j, c] = wo_w[c, h]
    g_h = jnp.repeat(wo_h.T, S, axis=0)
    g_slab = jnp.pad(jnp.concatenate([g_w, g_h], axis=0), ((0, 0), (0, L - C)))  # (2L, L)

    pos = params["pos_h"] + params["pos_w"]                       # (S, S) combined pos embedding

    def full(shape):
        return pl.BlockSpec(shape, lambda b, n=len(shape): (0,) * n)

    out = pl.pallas_call(
        axial_fused_kernel,
        out_shape=jax.ShapeDtypeStruct((B, 1, L), jnp.float32),
        grid=(B,),
        in_specs=[
            pl.BlockSpec((S, S), lambda b: (b, 0)),               # image b
            full((S, S)),                                         # positional embedding
            full((2 * S + 3, L)),                                 # wl_w | wl_h | sqk_w | sqk_h | bias
            full((2 * L, L)),                                     # g_w | g_h (lane-padded)
        ],
        out_specs=pl.BlockSpec((1, 1, L), lambda b: (b, 0, 0)),
        compiler_params=pltpu.CompilerParams(dimension_semantics=("parallel",)),
    )(x_flat, pos, const_slab, g_slab)
    return out.reshape(B, L)[:, :C]


# ---------------------------------------------------------------------------
# Deterministic parameter init (synthetic; matches the module's shapes)
# ---------------------------------------------------------------------------
def init_params(key, S):
    ks = jax.random.split(key, 13)

    def rnd(k, shape, scale):
        return jax.random.normal(k, shape, jnp.float32) * scale

    def attn_params(k0):
        kk = jax.random.split(k0, 5)
        return (rnd(kk[0], (C, C), 0.3),   # to_q   (out, in)
                rnd(kk[1], (C, C), 0.3),   # to_k   (out, in)  (= first half of to_kv)
                rnd(kk[2], (C, C), 0.3),   # to_v   (out, in)  (= second half of to_kv)
                rnd(kk[3], (C, C), 0.3),   # to_out (out, in)
                rnd(kk[4], (1, C), 0.1))   # to_out bias

    return {
        "pos_h": rnd(ks[0], (S, 1), 1.0),          # AxialPositionalEmbedding param_0 (1,1,S,1)
        "pos_w": rnd(ks[1], (1, S), 1.0),          # AxialPositionalEmbedding param_1 (1,1,1,S)
        "attn_h": attn_params(ks[2]),
        "attn_w": attn_params(ks[3]),
        "w_lin": rnd(ks[4], (1, S * S), 0.1),      # nn.Linear(S*S, 1) weight (out, in)
        "b_lin": rnd(ks[5], (1, 1), 0.1),          # nn.Linear(S*S, 1) bias
    }


# ---------------------------------------------------------------------------
# Pure-JAX full-fidelity reference (explicit 8-channel repeat, no simplifications)
# ---------------------------------------------------------------------------
def reference(x, params):
    B, _, S, _ = x.shape
    xr = jnp.tile(x, (1, C, 1, 1)) + params["pos_h"][None, None] + params["pos_w"][None, None]

    def self_attn(xs, wq, wk, wv, wo, bo):
        q, k, v = xs @ wq.T, xs @ wk.T, xs @ wv.T
        dots = jnp.einsum("nih,njh->nijh", q, k)            # scale = 1 (dim_heads=1)
        p = jax.nn.softmax(dots, axis=2)
        o = jnp.einsum("nijh,njh->nih", p, v)
        return o @ wo.T + bo

    xa = jnp.transpose(xr, (0, 3, 2, 1)).reshape(B * S, S, C)
    ya = jnp.transpose(self_attn(xa, *params["attn_h"]).reshape(B, S, S, C), (0, 3, 2, 1))
    xb = jnp.transpose(xr, (0, 2, 3, 1)).reshape(B * S, S, C)
    yb = jnp.transpose(self_attn(xb, *params["attn_w"]).reshape(B, S, S, C), (0, 3, 1, 2))
    y = (ya + yb).reshape(B, C, S * S)
    return (y @ params["w_lin"].T)[..., 0] + params["b_lin"][0, 0]


if __name__ == "__main__":
    key = jax.random.PRNGKey(0)
    kx, kp = jax.random.split(key)
    x = jax.random.normal(kx, (BATCH, 1, IMSIZE, IMSIZE), jnp.float32)
    params = init_params(kp, IMSIZE)

    out = jax.block_until_ready(axial_forward(x, params))
    assert out.shape == (BATCH, C), out.shape

    ref = reference(x, params)
    np.testing.assert_allclose(np.asarray(out), np.asarray(ref), rtol=5e-4, atol=5e-5)
    print("KERNEL_OK")
</pallas_src>

<mosaic_0001>
module attributes {stable_mosaic.version = 11 : i64} {
  func.func @axial_fused_kernel(%arg0: i32, %arg1: memref<16x16xf32, #tpu.memory_space<vmem>>, %arg2: memref<16x16xf32, #tpu.memory_space<vmem>>, %arg3: memref<35x128xf32, #tpu.memory_space<vmem>>, %arg4: memref<256x128xf32, #tpu.memory_space<vmem>>, %arg5: memref<1x1x128xf32, #tpu.memory_space<vmem>>) attributes {dimension_semantics = [#tpu.dimension_semantics<parallel>], iteration_bounds = array<i64: 2>, scalar_prefetch = 0 : i64, scratch_operands = 0 : i64, tpu.core_type = #tpu.core_type<tc>, window_params = [{transform_indices = @transform_0, window_bounds = array<i64: 16, 16>}, {pipeline_mode = #tpu.pipeline_mode<synchronous>, transform_indices = @transform_1, window_bounds = array<i64: 16, 16>}, {pipeline_mode = #tpu.pipeline_mode<synchronous>, transform_indices = @transform_2, window_bounds = array<i64: 35, 128>}, {pipeline_mode = #tpu.pipeline_mode<synchronous>, transform_indices = @transform_3, window_bounds = array<i64: 256, 128>}, {transform_indices = @transform_4, window_bounds = array<i64: 1, 1, 128>}]} {
    %c0 = arith.constant 0 : index
    %c0_0 = arith.constant 0 : index
    %0 = vector.load %arg1[%c0, %c0_0] : memref<16x16xf32, #tpu.memory_space<vmem>>, vector<16x16xf32>
    %c0_1 = arith.constant 0 : index
    %c0_2 = arith.constant 0 : index
    %1 = vector.load %arg2[%c0_1, %c0_2] : memref<16x16xf32, #tpu.memory_space<vmem>>, vector<16x16xf32>
    %2 = arith.addf %0, %1 : vector<16x16xf32>
    %3 = tpu.concatenate %2, %2, %2, %2, %2, %2, %2, %2 in 1 : vector<16x16xf32>, vector<16x16xf32>, vector<16x16xf32>, vector<16x16xf32>, vector<16x16xf32>, vector<16x16xf32>, vector<16x16xf32>, vector<16x16xf32> -> vector<16x128xf32>
    %c0_3 = arith.constant 0 : index
    %c0_4 = arith.constant 0 : index
    %4 = vector.load %arg3[%c0_3, %c0_4] : memref<35x128xf32, #tpu.memory_space<vmem>>, vector<16x128xf32>
    %c16 = arith.constant 16 : index
    %c0_5 = arith.constant 0 : index
    %5 = vector.load %arg3[%c16, %c0_5] : memref<35x128xf32, #tpu.memory_space<vmem>>, vector<16x128xf32>
    %c32 = arith.constant 32 : index
    %c0_6 = arith.constant 0 : index
    %6 = vector.load %arg3[%c32, %c0_6] : memref<35x128xf32, #tpu.memory_space<vmem>>, vector<1x128xf32>
    %c33 = arith.constant 33 : index
    %c0_7 = arith.constant 0 : index
    %7 = vector.load %arg3[%c33, %c0_7] : memref<35x128xf32, #tpu.memory_space<vmem>>, vector<1x128xf32>
    %c34 = arith.constant 34 : index
    %c0_8 = arith.constant 0 : index
    %8 = vector.load %arg3[%c34, %c0_8] : memref<35x128xf32, #tpu.memory_space<vmem>>, vector<1x128xf32>
    %9 = vector.broadcast %6 : vector<1x128xf32> to vector<16x128xf32>
    %10 = arith.mulf %3, %9 : vector<16x128xf32>
    %11 = vector.broadcast %7 : vector<1x128xf32> to vector<16x128xf32>
    %12 = arith.mulf %3, %11 : vector<16x128xf32>
    %13 = vector.shape_cast %2 : vector<16x16xf32> to vector<16x16x1xf32>
    %cst = arith.constant dense<0xFF800000> : vector<16xf32>
    %14 = vector.multi_reduction <maximumf>, %2, %cst [1] : vector<16x16xf32> to vector<16xf32>
    %15 = vector.shape_cast %14 : vector<16xf32> to vector<16x1xf32>
    %cst_9 = arith.constant dense<0x7F800000> : vector<16xf32>
    %16 = vector.multi_reduction <minimumf>, %2, %cst_9 [1] : vector<16x16xf32> to vector<16xf32>
    %17 = vector.shape_cast %16 : vector<16xf32> to vector<16x1xf32>
    %cst_10 = arith.constant 0.000000e+00 : f32
    %18 = vector.broadcast %cst_10 : f32 to vector<16x128xf32>
    %19 = arith.cmpf oge, %10, %18 : vector<16x128xf32>
    %20 = vector.broadcast %15 : vector<16x1xf32> to vector<16x128xf32>
    %21 = arith.mulf %10, %20 : vector<16x128xf32>
    %22 = vector.broadcast %17 : vector<16x1xf32> to vector<16x128xf32>
    %23 = arith.mulf %10, %22 : vector<16x128xf32>
    %24 = arith.select %19, %21, %23 : vector<16x128xi1>, vector<16x128xf32>
    %25 = vector.shape_cast %10 : vector<16x128xf32> to vector<16x1x128xf32>
    %26 = vector.broadcast %13 : vector<16x16x1xf32> to vector<16x16x128xf32>
    %27 = vector.broadcast %25 : vector<16x1x128xf32> to vector<16x16x128xf32>
    %28 = arith.mulf %26, %27 : vector<16x16x128xf32>
    %29 = vector.shape_cast %24 : vector<16x128xf32> to vector<16x1x128xf32>
    %30 = vector.broadcast %29 : vector<16x1x128xf32> to vector<16x16x128xf32>
    %31 = arith.subf %28, %30 : vector<16x16x128xf32>
    %32 = math.exp %31 : vector<16x16x128xf32>
    %cst_11 = arith.constant dense<0.000000e+00> : vector<16x128xf32>
    %33 = vector.multi_reduction <add>, %32, %cst_11 [1] : vector<16x16x128xf32> to vector<16x128xf32>
    %34 = vector.broadcast %13 : vector<16x16x1xf32> to vector<16x16x128xf32>
    %35 = arith.mulf %32, %34 : vector<16x16x128xf32>
    %cst_12 = arith.constant dense<0.000000e+00> : vector<16x128xf32>
    %36 = vector.multi_reduction <add>, %35, %cst_12 [1] : vector<16x16x128xf32> to vector<16x128xf32>
    %37 = arith.divf %36, %33 : vector<16x128xf32>
    %38 = arith.mulf %37, %4 : vector<16x128xf32>
    %cst_13 = arith.constant dense<0.000000e+00> : vector<128xf32>
    %39 = vector.multi_reduction <add>, %38, %cst_13 [0] : vector<16x128xf32> to vector<128xf32>
    %40 = vector.shape_cast %39 : vector<128xf32> to vector<1x128xf32>
    %41 = vector.shape_cast %3 : vector<16x128xf32> to vector<1x16x128xf32>
    %cst_14 = arith.constant dense<0xFF800000> : vector<128xf32>
    %42 = vector.multi_reduction <maximumf>, %3, %cst_14 [0] : vector<16x128xf32> to vector<128xf32>
    %43 = vector.shape_cast %42 : vector<128xf32> to vector<1x128xf32>
    %cst_15 = arith.constant dense<0x7F800000> : vector<128xf32>
    %44 = vector.multi_reduction <minimumf>, %3, %cst_15 [0] : vector<16x128xf32> to vector<128xf32>
    %45 = vector.shape_cast %44 : vector<128xf32> to vector<1x128xf32>
    %cst_16 = arith.constant 0.000000e+00 : f32
    %46 = vector.broadcast %cst_16 : f32 to vector<16x128xf32>
    %47 = arith.cmpf oge, %12, %46 : vector<16x128xf32>
    %48 = vector.broadcast %43 : vector<1x128xf32> to vector<16x128xf32>
    %49 = arith.mulf %12, %48 : vector<16x128xf32>
    %50 = vector.broadcast %45 : vector<1x128xf32> to vector<16x128xf32>
    %51 = arith.mulf %12, %50 : vector<16x128xf32>
    %52 = arith.select %47, %49, %51 : vector<16x128xi1>, vector<16x128xf32>
    %53 = vector.shape_cast %12 : vector<16x128xf32> to vector<16x1x128xf32>
    %54 = vector.broadcast %41 : vector<1x16x128xf32> to vector<16x16x128xf32>
    %55 = vector.broadcast %53 : vector<16x1x128xf32> to vector<16x16x128xf32>
    %56 = arith.mulf %54, %55 : vector<16x16x128xf32>
    %57 = vector.shape_cast %52 : vector<16x128xf32> to vector<16x1x128xf32>
    %58 = vector.broadcast %57 : vector<16x1x128xf32> to vector<16x16x128xf32>
    %59 = arith.subf %56, %58 : vector<16x16x128xf32>
    %60 = math.exp %59 : vector<16x16x128xf32>
    %cst_17 = arith.constant dense<0.000000e+00> : vector<16x128xf32>
    %61 = vector.multi_reduction <add>, %60, %cst_17 [1] : vector<16x16x128xf32> to vector<16x128xf32>
    %62 = vector.broadcast %41 : vector<1x16x128xf32> to vector<16x16x128xf32>
    %63 = arith.mulf %60, %62 : vector<16x16x128xf32>
    %cst_18 = arith.constant dense<0.000000e+00> : vector<16x128xf32>
    %64 = vector.multi_reduction <add>, %63, %cst_18 [1] : vector<16x16x128xf32> to vector<16x128xf32>
    %65 = arith.divf %64, %61 : vector<16x128xf32>
    %66 = arith.mulf %65, %5 : vector<16x128xf32>
    %cst_19 = arith.constant dense<0.000000e+00> : vector<128xf32>
    %67 = vector.multi_reduction <add>, %66, %cst_19 [0] : vector<16x128xf32> to vector<128xf32>
    %68 = vector.shape_cast %67 : vector<128xf32> to vector<1x128xf32>
    %69 = tpu.concatenate %40, %68 in 1 : vector<1x128xf32>, vector<1x128xf32> -> vector<1x256xf32>
    %c0_20 = arith.constant 0 : index
    %c0_21 = arith.constant 0 : index
    %70 = vector.load %arg4[%c0_20, %c0_21] : memref<256x128xf32, #tpu.memory_space<vmem>>, vector<256x128xf32>
    %cst_22 = arith.constant dense<0.000000e+00> : vector<1x128xf32>
    %71 = tpu.matmul %69, %70, %cst_22 {dimension_numbers = #tpu.dot_dimension_numbers<[1], [0], [0], [1], [0, 0, 1, 1], [], []>} : vector<1x256xf32>, vector<256x128xf32>, vector<1x128xf32> -> vector<1x128xf32>
    %72 = arith.addf %71, %8 : vector<1x128xf32>
    %73 = vector.shape_cast %72 : vector<1x128xf32> to vector<1x1x128xf32>
    %c0_23 = arith.constant 0 : index
    %c0_24 = arith.constant 0 : index
    %c0_25 = arith.constant 0 : index
    %74 = vector.load %arg5[%c0_23, %c0_24, %c0_25] : memref<1x1x128xf32, #tpu.memory_space<vmem>>, vector<1x1x128xf32>
    tpu.vector_store %arg5[%c0_23, %c0_24, %c0_25], %73 {strides = array<i32>} : memref<1x1x128xf32, #tpu.memory_space<vmem>>, vector<1x1x128xf32>,
    return
  }
  func.func @transform_0(%arg0: i32) -> (i32, i32) {
    %c0_i32 = arith.constant 0 : i32
    %c0_i32_0 = arith.constant 0 : i32
    return %arg0, %c0_i32 : i32, i32
  }
  func.func @transform_1(%arg0: i32) -> (i32, i32) {
    %c0_i32 = arith.constant 0 : i32
    %c0_i32_0 = arith.constant 0 : i32
    %c0_i32_1 = arith.constant 0 : i32
    return %c0_i32, %c0_i32_0 : i32, i32
  }
  func.func @transform_2(%arg0: i32) -> (i32, i32) {
    %c0_i32 = arith.constant 0 : i32
    %c0_i32_0 = arith.constant 0 : i32
    %c0_i32_1 = arith.constant 0 : i32
    return %c0_i32, %c0_i32_0 : i32, i32
  }
  func.func @transform_3(%arg0: i32) -> (i32, i32) {
    %c0_i32 = arith.constant 0 : i32
    %c0_i32_0 = arith.constant 0 : i32
    %c0_i32_1 = arith.constant 0 : i32
    return %c0_i32, %c0_i32_0 : i32, i32
  }
  func.func @transform_4(%arg0: i32) -> (i32, i32, i32) {
    %c0_i32 = arith.constant 0 : i32
    %c0_i32_0 = arith.constant 0 : i32
    %c0_i32_1 = arith.constant 0 : i32
    return %arg0, %c0_i32, %c0_i32_0 : i32, i32, i32
  }
}

</mosaic_0001>

<bundles_post_ra>
// kernel: tile.7
= control target key start
LH: loop header
LB: loop body
LE: loop exit
PB: predicated region body
PF: predicated region fallthrough
CT: control target
= control target key end

     0   :  { %vm4_vm0 = vcmask 1047556   ;;  %s209_s14 = smov 96   ;;  %s210_s19 = smov 112   ;;  %vm6_vm1 = vcmask 130048   ;;  %vm25_vm2 = vcmask 1048448   ;;  %vm46_vm3 = vcmask 917248   ;;  %s388_s0 = inlined_call_operand.vmem [shape: f32[16,8,16], index: 0, kind: input, shape index: {}]   ;;  %s389_s1 = inlined_call_operand.vmem [shape: f32[16,128], index: 1, kind: output, shape index: {}]  }
   0x1   :  { %v172_v0 = vld [vmem:[%s388_s0 + $0x6] ss:$8 sm:$0xf]   ;;  %v167_v3 = vld [vmem:[%s388_s0 + $0x7] ss:$8 sm:$0xf]  }
   0x2   :  { %v173_v1 = vld [vmem:[%s388_s0 + $0x6] ss:$8 sm:$0xf0]   ;;  %v168_v4 = vld [vmem:[%s388_s0 + $0x7] ss:$8 sm:$0xf0]  }
   0x3   :  { %v43_v2 = vsel %vm4_vm0, %v173_v1, %v172_v0  ;;  %v22_v5 = vsel %vm4_vm0, %v168_v4, %v167_v3  ;;  %v174_v6 = vld [vmem:[%s388_s0 + $0x46] ss:$8 sm:$0xf]   ;;  %v169_v9 = vld [vmem:[%s388_s0 + $0x47] ss:$8 sm:$0xf]  }
   0x4   :  { %44 = vrot.lane.b32.xlu1 %v43_v2, %s209_s14  ;;  %v175_v7 = vld [vmem:[%s388_s0 + $0x46] ss:$8 sm:$0xf0]   ;;  %23 = vrot.lane.b32.xlu0 %v22_v5, %s210_s19  ;;  %v170_v10 = vld [vmem:[%s388_s0 + $0x47] ss:$8 sm:$0xf0]  }
   0x5   :  { %v53_v8 = vsel %vm4_vm0, %v175_v7, %v174_v6  ;;  %v32_v11 = vsel %vm4_vm0, %v170_v10, %v169_v9  ;;  %v179_v12 = vld [vmem:[%s388_s0 + $0x45] ss:$8 sm:$0xf]   ;;  %v184_v18 = vld [vmem:[%s388_s0 + $0x44] ss:$8 sm:$0xf]  }
   0x6   :  { %v180_v13 = vld [vmem:[%s388_s0 + $0x45] ss:$8 sm:$0xf0]   ;;  %v185_v19 = vld [vmem:[%s388_s0 + $0x44] ss:$8 sm:$0xf0]  }
   0x7   :  { %v177_v14 = vld [vmem:[%s388_s0 + $0x5] ss:$8 sm:$0xf]   ;;  %v74_v16 = vsel %vm4_vm0, %v180_v13, %v179_v12  ;;  %v182_v20 = vld [vmem:[%s388_s0 + $0x4] ss:$8 sm:$0xf]   ;;  %v95_v22 = vsel %vm4_vm0, %v185_v19, %v184_v18 }
   0x8   :  { %54 = vrot.lane.b32.xlu1 %v53_v8, %s209_s14  ;;  %v178_v15 = vld [vmem:[%s388_s0 + $0x5] ss:$8 sm:$0xf0]   ;;  %33 = vrot.lane.b32.xlu0 %v32_v11, %s210_s19  ;;  %v183_v21 = vld [vmem:[%s388_s0 + $0x4] ss:$8 sm:$0xf0]  }
   0x9   :  { %v64_v17 = vsel %vm4_vm0, %v178_v15, %v177_v14  ;;  %s211_s11 = smov 80   ;;  %v85_v23 = vsel %vm4_vm0, %v183_v21, %v182_v20  ;;  %v189_v24 = vld [vmem:[%s388_s0 + $0x43] ss:$8 sm:$0xf]   ;;  %s212_s20 = smov 64   ;;  %vm67_vm4 = vcmask 786048  }
   0xa   :  { %v190_v25 = vld [vmem:[%s388_s0 + $0x43] ss:$8 sm:$0xf0]   ;;  %v194_v28 = vld [vmem:[%s388_s0 + $0x42] ss:$8 sm:$0xf]  }
   0xb   :  { %v187_v26 = vld [vmem:[%s388_s0 + $0x3] ss:$8 sm:$0xf]   ;;  %v195_v29 = vld [vmem:[%s388_s0 + $0x42] ss:$8 sm:$0xf0]   ;;  %v116_v30 = vsel %vm4_vm0, %v190_v25, %v189_v24 }
   0xc   :  { %75 = vrot.lane.b32.xlu1 %v74_v16, %s211_s11  ;;  %65 = vrot.lane.b32.xlu0 %v64_v17, %s211_s11  ;;  %v188_v27 = vld [vmem:[%s388_s0 + $0x3] ss:$8 sm:$0xf0]   ;;  %v192_v31 = vld [vmem:[%s388_s0 + $0x2] ss:$8 sm:$0xf]   ;;  %v137_v40 = vsel %vm4_vm0, %v195_v29, %v194_v28 }
   0xd   :  { %v2_v32 = vld [vmem:[%s388_s0] ss:$8 sm:$0xf]   ;;  %v106_v33 = vsel %vm4_vm0, %v188_v27, %v187_v26  ;;  %v193_v36 = vld [vmem:[%s388_s0 + $0x2] ss:$8 sm:$0xf0]  }
   0xe   :  { %v3_v34 = vld [vmem:[%s388_s0] ss:$8 sm:$0xf0]   ;;  %s213_s8 = smov 48   ;;  %v127_v41 = vsel %vm4_vm0, %v193_v36, %v192_v31  ;;  %s215_s21 = smov 16   ;;  %vm88_vm5 = vcmask 654848  }
   0xf   :  { %v164_v35 = vld [vmem:[%s388_s0 + $0x40] ss:$8 sm:$0xf]   ;;  %v5_v37 = vsel %vm4_vm0, %v3_v34, %v2_v32  ;;  %v199_v42 = vld [vmem:[%s388_s0 + $0x41] ss:$8 sm:$0xf]  }
  0x10   :  { %96 = vrot.lane.b32.xlu1 %v95_v22, %s212_s20  ;;  %86 = vrot.lane.b32.xlu0 %v85_v23, %s212_s20  ;;  %v165_v38 = vld [vmem:[%s388_s0 + $0x40] ss:$8 sm:$0xf0]   ;;  %7 = vst.msk [vmem:[%s389_s1] sm:$0xff] %vm6_vm1, %v5_v37   ;;  %vm109_vm6 = vcmask 523648   ;;  %vm130_vm7 = vcmask 392448  }
  0x11   :  { %v13_v39 = vsel %vm4_vm0, %v165_v38, %v164_v35  ;;  %v200_v43 = vld [vmem:[%s388_s0 + $0x41] ss:$8 sm:$0xf0]   ;;  %vm151_vm8 = vcmask 261248  }
  0x12   :  { %166 = vst.msk [vmem:[%s389_s1 + $0x8] sm:$0xff] %vm6_vm1, %v13_v39   ;;  %v197_v44 = vld [vmem:[%s388_s0 + $0x1] ss:$8 sm:$0xf]   ;;  %v158_v46 = vsel %vm4_vm0, %v200_v43, %v199_v42 }
  0x13   :  { %v198_v45 = vld [vmem:[%s388_s0 + $0x1] ss:$8 sm:$0xf0]   ;;  %s214_s0 = smov 32  }
  0x14   :  { %117 = vrot.lane.b32.xlu1 %v116_v30, %s213_s8  ;;  %107 = vrot.lane.b32.xlu0 %v106_v33, %s213_s8  ;;  %v148_v47 = vsel %vm4_vm0, %v198_v45, %v197_v44 }
  0x18   :  { %138 = vrot.lane.b32.xlu1 %v137_v40, %s214_s0  ;;  %128 = vrot.lane.b32.xlu0 %v127_v41, %s214_s0 }
  0x1c   :  { %159 = vrot.lane.b32.xlu1 %v158_v46, %s215_s21  ;;  %149 = vrot.lane.b32.xlu0 %v148_v47, %s215_s21 }
  0x76   :  { %v45_v48 = vpop.permute.xlu1 %44   ;;  %v24_v49 = vpop.permute.xlu0 %23  }
  0x77   :  { %26 = vst.msk [vmem:[%s389_s1] sm:$0xff] %vm25_vm2, %v24_v49  }
  0x78   :  { %47 = vst.msk [vmem:[%s389_s1] sm:$0xff] %vm46_vm3, %v45_v48  }
  0x7a   :  { %v55_v50 = vpop.permute.xlu1 %54   ;;  %v34_v51 = vpop.permute.xlu0 %33  }
  0x7b   :  { %171 = vst.msk [vmem:[%s389_s1 + $0x8] sm:$0xff] %vm25_vm2, %v34_v51  }
  0x7c   :  { %176 = vst.msk [vmem:[%s389_s1 + $0x8] sm:$0xff] %vm46_vm3, %v55_v50  }
  0x7e   :  { %v76_v52 = vpop.permute.xlu1 %75   ;;  %v66_v53 = vpop.permute.xlu0 %65  }
  0x7f   :  { %181 = vst.msk [vmem:[%s389_s1 + $0x8] sm:$0xff] %vm67_vm4, %v76_v52   ;;  %68 = vst.msk [vmem:[%s389_s1] sm:$0xff] %vm67_vm4, %v66_v53  }
  0x82   :  { %v97_v54 = vpop.permute.xlu1 %96   ;;  %v87_v55 = vpop.permute.xlu0 %86  }
  0x83   :  { %186 = vst.msk [vmem:[%s389_s1 + $0x8] sm:$0xff] %vm88_vm5, %v97_v54   ;;  %89 = vst.msk [vmem:[%s389_s1] sm:$0xff] %vm88_vm5, %v87_v55  }
  0x86   :  { %v118_v56 = vpop.permute.xlu1 %117   ;;  %v108_v57 = vpop.permute.xlu0 %107  }
  0x87   :  { %191 = vst.msk [vmem:[%s389_s1 + $0x8] sm:$0xff] %vm109_vm6, %v118_v56   ;;  %110 = vst.msk [vmem:[%s389_s1] sm:$0xff] %vm109_vm6, %v108_v57  }
  0x8a   :  { %v139_v58 = vpop.permute.xlu1 %138   ;;  %v129_v59 = vpop.permute.xlu0 %128  }
  0x8b   :  { %196 = vst.msk [vmem:[%s389_s1 + $0x8] sm:$0xff] %vm130_vm7, %v139_v58   ;;  %131 = vst.msk [vmem:[%s389_s1] sm:$0xff] %vm130_vm7, %v129_v59  }
  0x8e   :  { %v160_v60 = vpop.permute.xlu1 %159   ;;  %v150_v61 = vpop.permute.xlu0 %149  }
  0x8f   :  { %201 = vst.msk [vmem:[%s389_s1 + $0x8] sm:$0xff] %vm151_vm8, %v160_v60   ;;  %152 = vst.msk [vmem:[%s389_s1] sm:$0xff] %vm151_vm8, %v150_v61  }

// kernel: mul.15
= control target key start
LH: loop header
LB: loop body
LE: loop exit
PB: predicated region body
PF: predicated region fallthrough
CT: control target
= control target key end

     0   :  { %s69_s10 = smov 112   ;;  %s70_s11 = smov 80   ;;  %vm3_vm0 = vcmask 130048   ;;  %vm9_vm1 = vcmask 1048448   ;;  %vm15_vm2 = vcmask 917248   ;;  %vm21_vm3 = vcmask 786048   ;;  %s113_s0 = inlined_call_operand.vmem [shape: f32[8,16], index: 0, kind: input, shape index: {}]   ;;  %s114_s1 = inlined_call_operand.vmem [shape: f32[128], index: 1, kind: output, shape index: {}]  }
   0x1   :  { %v55_v0 = vld [vmem:[%s113_s0 + $0x7] sm:$0x1]   ;;  %v57_v1 = vld [vmem:[%s113_s0 + $0x5] sm:$0x1]   ;;  %v56_v2 = vld [vmem:[%s113_s0 + $0x6] sm:$0x1]  }
   0x2   :  { %7 = vrot.lane.b32.xlu0 %v55_v0, %s69_s10  ;;  %19 = vrot.lane.b32.xlu1 %v57_v1, %s70_s11  ;;  %v58_v3 = vld [vmem:[%s113_s0 + $0x4] sm:$0x1]   ;;  %v2_v4 = vld [vmem:[%s113_s0] sm:$0x1]   ;;  %s71_s18 = smov 96   ;;  %s72_s19 = smov 64  }
   0x3   :  { %4 = vst.msk [vmem:[#allocation0] sm:$0x1] %vm3_vm0, %v2_v4   ;;  %v59_v5 = vld [vmem:[%s113_s0 + $0x3] sm:$0x1]   ;;  %v60_v6 = vld [vmem:[%s113_s0 + $0x2] sm:$0x1]  }
   0x4   :  { %s73_s24 = smov 48   ;;  %s74_s25 = smov 32   ;;  %v61_v7 = vld [vmem:[%s113_s0 + $0x1] sm:$0x1]   ;;  %vm27_vm4 = vcmask 654848   ;;  %vm33_vm5 = vcmask 523648  }
   0x5   :  { %s75_s0 = smov 16   ;;  %vm39_vm6 = vcmask 392448   ;;  %vm45_vm7 = vcmask 261248  }
   0x6   :  { %13 = vrot.lane.b32.xlu0 %v56_v2, %s71_s18  ;;  %25 = vrot.lane.b32.xlu1 %v58_v3, %s72_s19 }
   0xa   :  { %31 = vrot.lane.b32.xlu0 %v59_v5, %s73_s24  ;;  %37 = vrot.lane.b32.xlu1 %v60_v6, %s74_s25 }
   0xe   :  { %43 = vrot.lane.b32.xlu0 %v61_v7, %s75_s0 }
  0x74   :  { %v8_v8 = vpop.permute.xlu0 %7   ;;  %v20_v9 = vpop.permute.xlu1 %19  }
  0x75   :  { %10 = vst.msk [vmem:[#allocation0] sm:$0x1] %vm9_vm1, %v8_v8  }
  0x78   :  { %v14_v10 = vpop.permute.xlu0 %13   ;;  %v26_v11 = vpop.permute.xlu1 %25  }
  0x79   :  { %16 = vst.msk [vmem:[#allocation0] sm:$0x1] %vm15_vm2, %v14_v10  }
  0x7a   :  { %22 = vst.msk [vmem:[#allocation0] sm:$0x1] %vm21_vm3, %v20_v9  }
  0x7b   :  { %28 = vst.msk [vmem:[#allocation0] sm:$0x1] %vm27_vm4, %v26_v11  }
  0x7c   :  { %v32_v12 = vpop.permute.xlu0 %31   ;;  %v38_v13 = vpop.permute.xlu1 %37  }
  0x7d   :  { %34 = vst.msk [vmem:[#allocation0] sm:$0x1] %vm33_vm5, %v32_v12  }
  0x7e   :  { %40 = vst.msk [vmem:[#allocation0] sm:$0x1] %vm39_vm6, %v38_v13  }
  0x80   :  { %v44_v14 = vpop.permute.xlu0 %43  }
  0x81   :  { %46 = vst.msk [vmem:[#allocation0] sm:$0x1] %vm45_vm7, %v44_v14  }
  0x88   :  { %v51_v15 = vld [vmem:[#allocation0] sm:$0x1] }
  0x89   :  { %54 = vst [vmem:[%s114_s1] sm:$0x1] %v51_v15 }

// kernel: mul.12
= control target key start
LH: loop header
LB: loop body
LE: loop exit
PB: predicated region body
PF: predicated region fallthrough
CT: control target
= control target key end

     0   :  { %s34_s0 = inlined_call_operand.vmem [shape: f32[8], index: 0, kind: input, shape index: {}]   ;;  %s35_s1 = inlined_call_operand.vmem [shape: f32[8], index: 1, kind: input, shape index: {}]   ;;  %s36_s2 = inlined_call_operand.vmem [shape: f32[8], index: 2, kind: output, shape index: {}]  }
   0x1   :  { %v3_v0 = vld [vmem:[%s34_s0] sm:$0x1] }
   0x2   :  { %v4_v1 = vld [vmem:[%s35_s1] sm:$0x1] }
   0x3   :  { %v7_v2 = vmul.f32 %v4_v1, %v3_v0 }
   0x5   :  { %9 = vst [vmem:[%s36_s2] sm:$0x1] %v7_v2 }

// kernel: axial_forward.1
= control target key start
LH: loop header
LB: loop body
LE: loop exit
PB: predicated region body
PF: predicated region fallthrough
CT: control target
= control target key end

     0   :  { %9 = vsyncpa [#allocation3], 0  ;;  %s4361_s0 = inlined_call_operand.vmem [shape: f32[32,16], index: 0, kind: input, shape index: {}]   ;;  %s4362_s1 = inlined_call_operand.vmem [shape: f32[16,16], index: 1, kind: input, shape index: {}]   ;;  %s4363_s2 = inlined_call_operand.vmem [shape: f32[35,128], index: 2, kind: input, shape index: {}]   ;;  %s4364_s3 = inlined_call_operand.vmem [shape: f32[256,128], index: 3, kind: input, shape index: {}]   ;;  %s4365_s4 = inlined_call_operand.hbm [shape: f32[2,1,128], index: 4, kind: output, shape index: {}]  }
   0x1   :  { %11 = vsyncpa [#allocation3 + $0x1], 0  ;;  %s2822_s15 = smov 0   ;;  %s2824_s16 = smov 0  }
   0x2   :  { %s2826_s17 = smov 0   ;;  %s2828_s18 = smov 0  }
   0x3 LB: > { %s2843_s19 = sadd.s32 4294967295, %s2786_s18   ;;  %s2437_s20 = sadd.s32 4294967294, %s2786_s18   ;;  %s2786_s18 = sphi %s2828_s18, %s4546_s18   ;;  %s2782_s17 = sphi %s2826_s17, %s4545_s17   ;;  %s2778_s16 = sphi %s2824_s16, %s4544_s16   ;;  %s2774_s15 = sphi %s2822_s15, %s4543_s15  }
   0x4   : > { %s2847_s21 = sadd.s32 1, %s2786_s18   ;;  %s113_s22 = sadd.s32 1, %s2782_s17 }
   0x5   : > { %s110_s23 = ssub.s32 %s2786_s18, %s2847_s21  ;;  %p123_p0 = scmp.ne.s32.totalorder %s2782_s17, %s2778_s16 }
   0x6   : > { %p111_p1 = scmp.eq.s32.totalorder %s110_s23, 0  ;;  %p124_p2 = scmp.eq.s32.totalorder %s2843_s19, 1 }
   0x7   : > { %p129_p3 = scmp.ne.s32.totalorder %s2778_s16, %s2774_s15  ;;  %p130_p4 = scmp.eq.s32.totalorder %s2437_s20, 1 }
   0x8   : > { %s2858_s24 = scalar_select %p111_p1, %s2782_s17, %s113_s22  }
   0x9   : > { %p2860_p5 = por %p124_p2, %p123_p0  ;;  %p2864_p6 = por %p130_p4, %p129_p3 }
   0xa   : > { %p2440_p7 = scmp.ge.s32.totalorder %s2786_s18, 1  ;;  %p166_p8 = scmp.lt.s32.totalorder %s2786_s18, 3 }
   0xc   : > { %p167_p9 = pnand %p2440_p7, %p166_p8 }
   0xe   : > { %170 = sbr.rel (%p167_p9) target bundleno = 717 (0x2cd), region = 36 }
  0x13   : > { %s2441_s27 = sshll.u32 %s2843_s19, 1  ;;  %v199_v0 = vld [vmem:[%s4362_s1] sm:$0xff]  ;;  %v200_v3 = vld [vmem:[%s4362_s1 + $0x8] sm:$0xff]  ;;  %s2788_s10 = smov 32   ;;  %vm247_vm0 = vcmask 130048   ;;  %v287_v10 = vlaneseq  ;;  %vm250_vm1 = vcmask 261120  }
  0x14   : > { %p192_p10 = scmp.lt.s32.totalorder %s2441_s27, 3  ;;  %s2789_s11 = smov 16   ;;  %v2795_v46 = vmov 1966171168   ;;  %vm253_vm2 = vcmask 392192   ;;  %vm256_vm3 = vcmask 523264  }
  0x15   : > { %s2790_s12 = smov 48   ;;  %s2791_s13 = smov 64   ;;  %v2906_v11 = vshrl.u32 %v287_v10, 7  ;;  %v487_v47 = vunpack.c.l.s4 %v2795_v46  ;;  %vm259_vm4 = vcmask 654336   ;;  %vm262_vm5 = vcmask 785408  }
  0x16   : > { %s4548_s27 = smov (!%p192_p10, %s2441_s27), 3  ;;  %s2792_s14 = smov 80   ;;  %vm265_vm6 = vcmask 916480   ;;  %vm1324_vm11 = vcmask 1041409   ;;  %vm1327_vm12 = vcmask 1042434   ;;  %vm1330_vm13 = vcmask 1043459  }
  0x17   : > { %s2442_s28 = sshll.u32 %s4548_s27, 3  ;;  %s2793_s20 = smov 96   ;;  %v300_v12 = vsub.s32 1, %v2906_v11  ;;  %v311_v15 = vsub.s32 2, %v2906_v11  ;;  %v2914_v17 = vsub.s32 0, %v2906_v11  ;;  %v322_v20 = vsub.s32 3, %v2906_v11 }
  0x18   : > { %s195_s7 = scalar_lea.vmem %s4361_s0, %s2442_s28  ;;  %s2794_s22 = smov 112   ;;  %v333_v24 = vsub.s32 4, %v2906_v11  ;;  %v344_v27 = vsub.s32 5, %v2906_v11  ;;  %v355_v34 = vsub.s32 6, %v2906_v11  ;;  %v366_v41 = vsub.s32 7, %v2906_v11 }
  0x19   : > { %v197_v1 = vld [vmem:[%s195_s7] sm:$0xff]  ;;  %v198_v2 = vld [vmem:[%s195_s7 + $0x8] sm:$0xff]  ;;  %4411 = vst [vmem:[#allocation5_spill] sm:$0xff] %v2914_v17  ;;  %v488_v55 = vunpack.c.0.s8 %v487_v47  ;;  %vm1333_vm14 = vcmask 1044484   ;;  %vm1336_vm15 = vcmask 1045509   ;;  %s2445_s28 = sshll.u32 %s2843_s19, 4 }
  0x1a   : > { %v2880_v4 = vadd.f32 %v199_v0, %v197_v1  ;;  %v2884_v5 = vadd.f32 %v200_v3, %v198_v2  ;;  %v2443_v1 = vld [vmem:[%s4363_s2 + $0x20] ss:$0 sm:$0xff]  ;;  %s2380_s7 = scalar_lea.hbm %s4365_s4, %s2445_s28 }
  0x1c   : > { %211 = vrot.lane.b32.xlu1 %v2880_v4, %s2788_s10  ;;  %205 = vrot.lane.b32.xlu0 %v2880_v4, %s2789_s11  ;;  %v463_v6 = vsel %vm247_vm0, %v2880_v4, -inf  ;;  %v469_v7 = vsel %vm247_vm0, %v2880_v4, inf  ;;  %v466_v8 = vsel %vm247_vm0, %v2884_v5, -inf  ;;  %v472_v9 = vsel %vm247_vm0, %v2884_v5, inf }
  0x1d   : > { %v301_v13 = vrot.slane %v2880_v4, %v300_v12  ;;  %v389_v14 = vrot.slane %v2884_v5, %v300_v12  ;;  %v312_v16 = vrot.slane %v2880_v4, %v311_v15  ;;  %v400_v18 = vrot.slane %v2884_v5, %v311_v15  ;;  %v2975_v15 = vld [vmem:[%s4363_s2 + $0x8] sm:$0xff] }
  0x1e   : > { %v290_v19 = vrot.slane %v2880_v4, %v2914_v17  ;;  %v323_v21 = vrot.slane %v2880_v4, %v322_v20  ;;  %v378_v22 = vrot.slane %v2884_v5, %v2914_v17  ;;  %v411_v23 = vrot.slane %v2884_v5, %v322_v20  ;;  %4416 = vst [vmem:[#allocation10_spill] sm:$0xff] %v2975_v15 }
  0x1f   : > { %v334_v25 = vrot.slane %v2880_v4, %v333_v24  ;;  %v422_v26 = vrot.slane %v2884_v5, %v333_v24  ;;  %v345_v30 = vrot.slane %v2880_v4, %v344_v27  ;;  %v433_v33 = vrot.slane %v2884_v5, %v344_v27 }
  0x20   : > { %213 = vrot.lane.b32.xlu1 %v2884_v5, %s2788_s10  ;;  %207 = vrot.lane.b32.xlu0 %v2884_v5, %s2789_s11  ;;  %v356_v37 = vrot.slane %v2880_v4, %v355_v34  ;;  %v444_v40 = vrot.slane %v2884_v5, %v355_v34  ;;  %v367_v48 = vrot.slane %v2880_v4, %v366_v41  ;;  %s2796_s10 = smov [#allocation2]  }
  0x21   : > { %v455_v60 = vrot.slane %v2884_v5, %v366_v41  ;;  %s2730_s11 = sshll.u32 %s2796_s10, 4  ;;  %s2731_s11 = int_to_ptr.vmem [resolvable:$false] %s2730_s11 }
  0x22   : > { %s2732_s19 = scalar_lea.vmem %s2731_s11, 32 }
  0x24   : > { %219 = vrot.lane.b32.xlu1 %v2884_v5, %s2790_s12  ;;  %217 = vrot.lane.b32.xlu0 %v2880_v4, %s2790_s12 }
  0x28   : > { %225 = vrot.lane.b32.xlu1 %v2884_v5, %s2791_s13  ;;  %223 = vrot.lane.b32.xlu0 %v2880_v4, %s2791_s13 }
  0x2c   : > { %231 = vrot.lane.b32.xlu1 %v2884_v5, %s2792_s14  ;;  %229 = vrot.lane.b32.xlu0 %v2880_v4, %s2792_s14 }
  0x30   : > { %237 = vrot.lane.b32.xlu1 %v2884_v5, %s2793_s20  ;;  %235 = vrot.lane.b32.xlu0 %v2880_v4, %s2793_s20 }
  0x34   : > { %243 = vrot.lane.b32.xlu1 %v2884_v5, %s2794_s22  ;;  %241 = vrot.lane.b32.xlu0 %v2880_v4, %s2794_s22  ;;  %s189_s22 = sand.u32 1, %s2778_s16  }
  0x35   : > { %s190_s29 = scalar_lea.vmem [#allocation2], %s189_s22  ;;  %s2370_s8 = scalar_lea.sflag [#allocation3], %s189_s22 }
  0x36   : > { %s2382_s30 = sshll.u32 %s190_s29, 4  ;;  %s2383_s30 = int_to_ptr.vmem [resolvable:$true] %s2382_s30 }
  0x37   : > { %s2726_s9 = scalar_lea.vmem %s2383_s30, 16  ;;  %p2733_p0 = scmp.lt.s32.totalorder %s2383_s30, %s2731_s11 }
  0x38   : > { %p2727_p11 = scmp.ne.s32.totalorder %s2383_s30, %s2726_s9  ;;  %p2734_p1 = scmp.lt.s32.totalorder %s2732_s19, %s2726_s9 }
  0x3a   : > { %p2728_p12 = pnand %p2727_p11, %p2860_p5  ;;  %p2735_p2 = por %p2734_p1, %p2733_p0 }
  0x3c   : > { %p2729_p13 = pneg %p2728_p12 }
  0x3e   : > { %p2736_p3 = pnand %p2735_p2, %p2729_p13 }
  0x53   : > { %464 = vmax.xlane.f32.xlu0 %v463_v6 }
  0x57   : > { %470 = vmin.xlane.f32.xlu0 %v469_v7 }
  0x58   : > { %467 = vmax.xlane.f32.xlu1 %v466_v8 }
  0x5b   : > { %473 = vmin.xlane.f32.xlu0 %v472_v9 }
  0x69   : > { %303 = vbcast.lane.b32.xlu1 %v301_v13, 256 }
  0x6d   : > { %391 = vbcast.lane.b32.xlu1 %v389_v14, 256 }
  0x71   : > { %307 = vbcast.lane.b32.xlu0 %v301_v13, 264  ;;  %395 = vbcast.lane.b32.xlu1 %v389_v14, 264  ;;  %v2968_v13 = vld [vmem:[%s4363_s2] sm:$0xff] }
  0x72   : > { %4415 = vst [vmem:[#allocation9_spill] sm:$0xff] %v2968_v13 }
  0x75   : > { %314 = vbcast.lane.b32.xlu0 %v312_v16, 256  ;;  %318 = vbcast.lane.b32.xlu1 %v312_v16, 264 }
  0x79   : > { %402 = vbcast.lane.b32.xlu0 %v400_v18, 256  ;;  %406 = vbcast.lane.b32.xlu1 %v400_v18, 264 }
  0x7d   : > { %292 = vbcast.lane.b32.xlu0 %v290_v19, 256  ;;  %296 = vbcast.lane.b32.xlu1 %v290_v19, 264 }
  0x81   : > { %325 = vbcast.lane.b32.xlu0 %v323_v21, 256  ;;  %329 = vbcast.lane.b32.xlu1 %v323_v21, 264 }
  0x85   : > { %380 = vbcast.lane.b32.xlu0 %v378_v22, 256  ;;  %384 = vbcast.lane.b32.xlu1 %v378_v22, 264 }
  0x89   : > { %413 = vbcast.lane.b32.xlu0 %v411_v23, 256  ;;  %417 = vbcast.lane.b32.xlu1 %v411_v23, 264 }
  0x8d   : > { %336 = vbcast.lane.b32.xlu0 %v334_v25, 256  ;;  %340 = vbcast.lane.b32.xlu1 %v334_v25, 264 }
  0x8e   : > { %v212_v28 = vpop.permute.xlu1 %211  ;;  %v206_v29 = vpop.permute.xlu0 %205 }
  0x8f   : > { %v248_v44 = vsel %vm247_vm0, %v2880_v4, %v206_v29  ;;  %v2948_v4 = vsub.s32 %v488_v55, %v2906_v11  ;;  %v2444_v11 = vld [vmem:[%s4363_s2 + $0x21] ss:$0 sm:$0xff] }
  0x90   : > { %v251_v50 = vsel %vm250_vm1, %v248_v44, %v212_v28 }
  0x91   : > { %424 = vbcast.lane.b32.xlu0 %v422_v26, 256  ;;  %428 = vbcast.lane.b32.xlu1 %v422_v26, 264  ;;  %4414 = vst [vmem:[#allocation8_spill] sm:$0xff] %v2948_v4 }
  0x92   : > { %v214_v31 = vpop.permute.xlu1 %213  ;;  %v208_v32 = vpop.permute.xlu0 %207 }
  0x93   : > { %v249_v45 = vsel %vm247_vm0, %v2884_v5, %v208_v32  ;;  %vm1339_vm0 = vcmask 1046534  }
  0x94   : > { %v252_v49 = vsel %vm250_vm1, %v249_v45, %v214_v31  ;;  %vm1342_vm1 = vcmask 1047559  }
  0x95   : > { %347 = vbcast.lane.b32.xlu0 %v345_v30, 256  ;;  %351 = vbcast.lane.b32.xlu1 %v345_v30, 264 }
  0x96   : > { %v220_v35 = vpop.permute.xlu1 %219  ;;  %v218_v36 = vpop.permute.xlu0 %217 }
  0x97   : > { %v255_v53 = vsel %vm253_vm2, %v252_v49, %v220_v35  ;;  %v254_v54 = vsel %vm253_vm2, %v251_v50, %v218_v36 }
  0x99   : > { %435 = vbcast.lane.b32.xlu0 %v433_v33, 256  ;;  %439 = vbcast.lane.b32.xlu1 %v433_v33, 264 }
  0x9a   : > { %v226_v38 = vpop.permute.xlu1 %225  ;;  %v224_v39 = vpop.permute.xlu0 %223 }
  0x9b   : > { %v258_v56 = vsel %vm256_vm3, %v255_v53, %v226_v38  ;;  %v257_v57 = vsel %vm256_vm3, %v254_v54, %v224_v39 }
  0x9d   : > { %358 = vbcast.lane.b32.xlu0 %v356_v37, 256  ;;  %362 = vbcast.lane.b32.xlu1 %v356_v37, 264 }
  0x9e   : > { %v232_v42 = vpop.permute.xlu1 %231  ;;  %v230_v43 = vpop.permute.xlu0 %229 }
  0x9f   : > { %v261_v58 = vsel %vm259_vm4, %v258_v56, %v232_v42  ;;  %v260_v59 = vsel %vm259_vm4, %v257_v57, %v230_v43 }
  0xa1   : > { %446 = vbcast.lane.b32.xlu0 %v444_v40, 256  ;;  %450 = vbcast.lane.b32.xlu1 %v444_v40, 264 }
  0xa2   : > { %v238_v51 = vpop.permute.xlu1 %237  ;;  %v236_v52 = vpop.permute.xlu0 %235 }
  0xa3   : > { %v264_v61 = vsel %vm262_vm5, %v261_v58, %v238_v51  ;;  %v263_v62 = vsel %vm262_vm5, %v260_v59, %v236_v52 }
  0xa5   : > { %369 = vbcast.lane.b32.xlu0 %v367_v48, 256  ;;  %373 = vbcast.lane.b32.xlu1 %v367_v48, 264 }
  0xa6   : > { %v244_v63 = vpop.permute.xlu1 %243  ;;  %v242_v0 = vpop.permute.xlu0 %241 }
  0xa7   : > { %v2943_v2 = vsel %vm265_vm6, %v264_v61, %v244_v63  ;;  %v2945_v3 = vsel %vm265_vm6, %v263_v62, %v242_v0 }
  0xa8   : > { %4412 = vst [vmem:[#allocation6_spill] sm:$0xff] %v2943_v2  ;;  %4413 = vst [vmem:[#allocation7_spill] sm:$0xff] %v2945_v3  ;;  %v2951_v5 = vmul.f32 %v2443_v1, %v2945_v3  ;;  %v1367_v6 = vmax.f32 %v2945_v3, %v2943_v2  ;;  %v1374_v7 = vmin.f32 %v2945_v3, %v2943_v2 }
  0xa9   : > { %457 = vbcast.lane.b32.xlu0 %v455_v60, 256  ;;  %461 = vbcast.lane.b32.xlu1 %v455_v60, 264  ;;  %v2958_v8 = vmul.f32 %v2443_v1, %v2943_v2  ;;  %v2980_v20 = vmul.f32 %v2444_v11, %v2945_v3  ;;  %v2983_v21 = vmul.f32 %v2444_v11, %v2943_v2 }
  0xaa   : > { %v1368_v9 = vrot.slane %v1367_v6, 4  ;;  %v1375_v10 = vrot.slane %v1374_v7, 4  ;;  %v492_v12 = vrot.slane %v2951_v5, %v2948_v4  ;;  %v485_v19 = vcombine.high %v2951_v5, %v2951_v5 }
  0xab   : > { %v541_v14 = vrot.slane %v2958_v8, %v2948_v4  ;;  %v534_v25 = vcombine.high %v2958_v8, %v2958_v8  ;;  %v1391_v33 = vcombine.high %v2980_v20, %v2980_v20  ;;  %v1398_v36 = vrot.slane %v2980_v20, %v2948_v4 }
  0xac   : > { %v1369_v16 = vmax.f32 %v1367_v6, %v1368_v9  ;;  %v1376_v18 = vmin.f32 %v1374_v7, %v1375_v10  ;;  %v500_v22 = vcombine.high %v492_v12, %v492_v12  ;;  %v508_v27 = vrot.slane %v492_v12, %v2948_v4 }
  0xad   : > { %v549_v26 = vcombine.high %v541_v14, %v541_v14  ;;  %v557_v30 = vrot.slane %v541_v14, %v2948_v4  ;;  %v2993_v32 = vrot.slane %v485_v19, %v2948_v4  ;;  %v1440_v37 = vcombine.high %v2983_v21, %v2983_v21 }
  0xae   : > { %v1370_v28 = vrot.slane %v1369_v16, 2  ;;  %v1377_v29 = vrot.slane %v1376_v18, 2  ;;  %v522_v38 = vrot.slane %v500_v22, %v2948_v4  ;;  %v3003_v39 = vrot.slane %v534_v25, %v2948_v4 }
  0xaf   : > { %4417 = vst [vmem:[#allocation11_spill] sm:$0xff] %v2993_v32  ;;  %v1405_v40 = vrot.slane %v1391_v33, %v2948_v4  ;;  %v1447_v41 = vrot.slane %v2983_v21, %v2948_v4  ;;  %v571_v42 = vrot.slane %v549_v26, %v2948_v4  ;;  %v530_v43 = vcombine.high %v508_v27, %v508_v27 }
  0xb0   : > { %v1371_v34 = vmax.f32 %v1369_v16, %v1370_v28  ;;  %v1378_v35 = vmin.f32 %v1376_v18, %v1377_v29  ;;  %4418 = vst [vmem:[#allocation12_spill] sm:$0xff] %v3003_v39  ;;  %v579_v46 = vcombine.high %v557_v30, %v557_v30  ;;  %v1406_v48 = vcombine.high %v1398_v36, %v1398_v36 }
  0xb1   : > { %v1454_v49 = vrot.slane %v1440_v37, %v2948_v4  ;;  %v3012_v50 = vrot.slane %v508_v27, %v2914_v17  ;;  %v3015_v51 = vrot.slane %v557_v30, %v2914_v17  ;;  %v3019_v52 = vrot.slane %v2993_v32, %v2948_v4 }
  0xb2   : > { %v1372_v44 = vrot.slane %v1371_v34, 1  ;;  %v1379_v45 = vrot.slane %v1378_v35, 1  ;;  %v1407_v53 = vcombine.high %v1405_v40, %v1405_v40  ;;  %v3022_v54 = vrot.slane %v522_v38, %v2914_v17 }
  0xb3   : > { %4419 = vst [vmem:[#allocation13_spill] sm:$0xff] %v3012_v50  ;;  %4420 = vst [vmem:[#allocation14_spill] sm:$0xff] %v3015_v51  ;;  %v3026_v55 = vrot.slane %v3003_v39, %v2948_v4  ;;  %v1455_v57 = vcombine.high %v1447_v41, %v1447_v41  ;;  %v3029_v58 = vrot.slane %v571_v42, %v2914_v17  ;;  %vm1381_vm7 = vcmp.ge.f32.partialorder %v2980_v20, 0.0 }
  0xb4   : > { %4421 = vst [vmem:[#allocation15_spill] sm:$0xff] %v3019_v52  ;;  %v1373_v56 = vmax.f32 %v1371_v34, %v1372_v44  ;;  %v3032_v59 = vrot.slane %v530_v43, %v2914_v17  ;;  %v1380_v60 = vmin.f32 %v1378_v35, %v1379_v45  ;;  %v1456_v61 = vcombine.high %v1454_v49, %v1454_v49 }
  0xb5   : > { %4422 = vst [vmem:[#allocation16_spill] sm:$0xff] %v3026_v55  ;;  %v3035_v62 = vrot.slane %v579_v46, %v2914_v17  ;;  %v532_v63 = vcombine.high %v522_v38, %v522_v38  ;;  %v1414_v0 = vrot.slane %v1398_v36, %v2948_v4  ;;  %v1428_v1 = vrot.slane %v1406_v48, %v2948_v4 }
  0xb6   : > { %4423 = vst [vmem:[#allocation17_spill] sm:$0xff] %v3032_v59  ;;  %v581_v7 = vcombine.high %v571_v42, %v571_v42  ;;  %v1421_v9 = vrot.slane %v1405_v40, %v2948_v4  ;;  %v1435_v10 = vrot.slane %v1407_v53, %v2948_v4  ;;  %v1383_v11 = vmul.f32 %v1373_v56, %v2980_v20 }
  0xb7   : > { %4424 = vst [vmem:[#allocation18_spill] sm:$0xff] %v3035_v62  ;;  %v1384_v12 = vmul.f32 %v1373_v56, %v2983_v21  ;;  %v1463_v14 = vrot.slane %v1447_v41, %v2948_v4  ;;  %v1477_v16 = vrot.slane %v1455_v57, %v2948_v4  ;;  %v1385_v18 = vmul.f32 %v1380_v60, %v2980_v20 }
  0xb8   : > { %v1386_v19 = vmul.f32 %v1380_v60, %v2983_v21  ;;  %v1470_v22 = vrot.slane %v1454_v49, %v2948_v4  ;;  %v1484_v25 = vrot.slane %v1456_v61, %v2948_v4  ;;  %v3052_v26 = vrot.slane %v3019_v52, %v2914_v17 }
  0xb9   : > { %v3056_v27 = vrot.slane %v3026_v55, %v2914_v17  ;;  %v1436_v28 = vcombine.high %v1414_v0, %v1414_v0  ;;  %v1438_v29 = vcombine.high %v1428_v1, %v1428_v1  ;;  %v3059_v30 = vrot.slane %v532_v63, %v2914_v17 }
  0xba   : > { %4425 = vst [vmem:[#allocation19_spill] sm:$0xff] %v3052_v26  ;;  %v1437_v33 = vcombine.high %v1421_v9, %v1421_v9  ;;  %v1439_v34 = vcombine.high %v1435_v10, %v1435_v10  ;;  %v3063_v35 = vrot.slane %v581_v7, %v2914_v17  ;;  %vm1382_vm8 = vcmp.ge.f32.partialorder %v2983_v21, 0.0 }
  0xbb   : > { %4426 = vst [vmem:[#allocation20_spill] sm:$0xff] %v3056_v27  ;;  %4427 = vst [vmem:[#allocation21_spill] sm:$0xff] %v3059_v30  ;;  %v1485_v36 = vcombine.high %v1463_v14, %v1463_v14  ;;  %v1487_v37 = vcombine.high %v1477_v16, %v1477_v16  ;;  %v1387_v38 = vsel %vm1381_vm7, %v1383_v11, %v1385_v18  ;;  %vm475_vm9 = vcmp.ge.f32.partialorder %v2951_v5, 0.0 }
  0xbc   : > { %4428 = vst [vmem:[#allocation22_spill] sm:$0xff] %v3063_v35  ;;  %v1388_v40 = vsel %vm1382_vm8, %v1384_v12, %v1386_v19  ;;  %v1486_v41 = vcombine.high %v1470_v22, %v1470_v22  ;;  %v1488_v42 = vcombine.high %v1484_v25, %v1484_v25  ;;  %v1492_v43 = vrot.slane %v1414_v0, %v2914_v17 }
  0xbd   : > { %v1496_v44 = vrot.slane %v1428_v1, %v2914_v17  ;;  %v1500_v45 = vrot.slane %v1436_v28, %v2914_v17  ;;  %v1504_v20 = vrot.slane %v1438_v29, %v2914_v17  ;;  %v1508_v46 = vrot.slane %v1421_v9, %v2914_v17 }
  0xbe   : > { %v1512_v48 = vrot.slane %v1435_v10, %v2914_v17  ;;  %v1516_v21 = vrot.slane %v1437_v33, %v2914_v17  ;;  %v1520_v49 = vrot.slane %v1439_v34, %v2914_v17  ;;  %v1524_v53 = vrot.slane %v1463_v14, %v2914_v17 }
  0xbf   : > { %v1528_v56 = vrot.slane %v1477_v16, %v2914_v17  ;;  %v1532_v57 = vrot.slane %v1485_v36, %v2914_v17  ;;  %v1536_v60 = vrot.slane %v1487_v37, %v2914_v17  ;;  %v1540_v61 = vrot.slane %v1470_v22, %v2914_v17 }
  0xc0   : > { %v1544_v63 = vrot.slane %v1484_v25, %v2914_v17  ;;  %v1548_v0 = vrot.slane %v1486_v41, %v2914_v17  ;;  %v1552_v1 = vrot.slane %v1488_v42, %v2914_v17  ;;  %v3083_v7 = vmul.f32 %v1492_v43, %v2945_v3 }
  0xc1   : > { %v3086_v9 = vmul.f32 %v1492_v43, %v2943_v2  ;;  %v3089_v10 = vmul.f32 %v1496_v44, %v2945_v3  ;;  %v3092_v11 = vmul.f32 %v1496_v44, %v2943_v2  ;;  %v3095_v12 = vmul.f32 %v1500_v45, %v2945_v3 }
  0xc2   : > { %v3098_v14 = vmul.f32 %v1500_v45, %v2943_v2  ;;  %v3101_v16 = vmul.f32 %v1504_v20, %v2945_v3  ;;  %v3104_v18 = vmul.f32 %v1504_v20, %v2943_v2  ;;  %v3107_v19 = vmul.f32 %v1508_v46, %v2945_v3 }
  0xc3   : > { %v3110_v22 = vmul.f32 %v1508_v46, %v2943_v2  ;;  %v3113_v25 = vmul.f32 %v1512_v48, %v2945_v3  ;;  %v3116_v28 = vmul.f32 %v1512_v48, %v2943_v2  ;;  %v1603_v29 = vcombine.high %v1387_v38, %v1387_v38 }
  0xc4   : > { %v1610_v33 = vrot.slane %v1387_v38, %v2948_v4  ;;  %v1652_v34 = vcombine.high %v1388_v40, %v1388_v40  ;;  %v1659_v36 = vrot.slane %v1388_v40, %v2948_v4  ;;  %v3121_v37 = vmul.f32 %v1516_v21, %v2945_v3 }
  0xc5   : > { %v3124_v41 = vmul.f32 %v1516_v21, %v2943_v2  ;;  %v3127_v42 = vmul.f32 %v1520_v49, %v2945_v3  ;;  %v3130_v43 = vmul.f32 %v1520_v49, %v2943_v2  ;;  %v3133_v44 = vmul.f32 %v1524_v53, %v2945_v3 }
  0xc6   : > { %v1617_v38 = vrot.slane %v1603_v29, %v2948_v4  ;;  %v1618_v45 = vcombine.high %v1610_v33, %v1610_v33  ;;  %v1666_v40 = vrot.slane %v1652_v34, %v2948_v4  ;;  %v3138_v20 = vmul.f32 %v1524_v53, %v2943_v2 }
  0xc7   : > { %v3141_v46 = vmul.f32 %v1528_v56, %v2945_v3  ;;  %v3144_v48 = vmul.f32 %v1528_v56, %v2943_v2  ;;  %v1667_v21 = vcombine.high %v1659_v36, %v1659_v36  ;;  %v3147_v49 = vmul.f32 %v1532_v57, %v2945_v3 }
  0xc8   : > { %v1619_v47 = vcombine.high %v1617_v38, %v1617_v38  ;;  %v1626_v6 = vrot.slane %v1610_v33, %v2948_v4  ;;  %v1640_v29 = vrot.slane %v1618_v45, %v2948_v4  ;;  %v3152_v34 = vmul.f32 %v1532_v57, %v2943_v2 }
  0xc9   : > { %v3155_v53 = vmul.f32 %v1536_v60, %v2945_v3  ;;  %v1633_v31 = vrot.slane %v1617_v38, %v2948_v4  ;;  %v1668_v24 = vcombine.high %v1666_v40, %v1666_v40  ;;  %v3159_v56 = vmul.f32 %v1536_v60, %v2943_v2 }
  0xca   : > { %v1647_v23 = vrot.slane %v1619_v47, %v2948_v4  ;;  %v1675_v55 = vrot.slane %v1659_v36, %v2948_v4  ;;  %v1689_v33 = vrot.slane %v1667_v21, %v2948_v4  ;;  %v3165_v45 = vmul.f32 %v1540_v61, %v2945_v3 }
  0xcb   : > { %v3168_v57 = vmul.f32 %v1540_v61, %v2943_v2  ;;  %v1682_v52 = vrot.slane %v1666_v40, %v2948_v4  ;;  %v1696_v38 = vrot.slane %v1668_v24, %v2948_v4  ;;  %v3173_v39 = vmul.f32 %v1544_v63, %v2945_v3 }
  0xcc   : > { %v3176_v60 = vmul.f32 %v1544_v63, %v2943_v2  ;;  %v1648_v47 = vcombine.high %v1626_v6, %v1626_v6  ;;  %v1650_v36 = vcombine.high %v1640_v29, %v1640_v29  ;;  %v3179_v21 = vmul.f32 %v1548_v0, %v2945_v3 }
  0xcd   : > { %v3182_v15 = vmul.f32 %v1548_v0, %v2943_v2  ;;  %v1649_v61 = vcombine.high %v1633_v31, %v1633_v31  ;;  %v1651_v27 = vcombine.high %v1647_v23, %v1647_v23  ;;  %v3185_v40 = vmul.f32 %v1552_v1, %v2945_v3 }
  0xce   : > { %v3188_v24 = vmul.f32 %v1552_v1, %v2943_v2  ;;  %v1697_v26 = vcombine.high %v1675_v55, %v1675_v55  ;;  %v1699_v35 = vcombine.high %v1689_v33, %v1689_v33  ;;  %v1698_v51 = vcombine.high %v1682_v52, %v1682_v52 }
  0xcf   : > { %v1700_v30 = vcombine.high %v1696_v38, %v1696_v38  ;;  %v1704_v50 = vrot.slane %v1626_v6, %v2914_v17  ;;  %v1708_v62 = vrot.slane %v1640_v29, %v2914_v17  ;;  %v1712_v0 = vrot.slane %v1648_v47, %v2914_v17 }
  0xd0   : > { %v3195_v59 = vrot.slane %v1650_v36, %v2914_v17  ;;  %v3198_v3 = vrot.slane %v1633_v31, %v2914_v17  ;;  %v3201_v1 = vrot.slane %v1647_v23, %v2914_v17  ;;  %v3204_v2 = vrot.slane %v1649_v61, %v2914_v17 }
  0xd1   : > { %v3207_v63 = vrot.slane %v1651_v27, %v2914_v17  ;;  %v3210_v6 = vrot.slane %v1675_v55, %v2914_v17  ;;  %v3213_v29 = vrot.slane %v1689_v33, %v2914_v17  ;;  %v3216_v47 = vrot.slane %v1697_v26, %v2914_v17 }
  0xd2   : > { %v3219_v31 = vrot.slane %v1699_v35, %v2914_v17  ;;  %v3222_v23 = vrot.slane %v1682_v52, %v2914_v17  ;;  %v3225_v36 = vrot.slane %v1696_v38, %v2914_v17  ;;  %v3228_v27 = vrot.slane %v1698_v51, %v2914_v17 }
  0xd3   : > { %v3231_v55 = vrot.slane %v1700_v30, %v2914_v17  ;;  %v1781_v33 = vsub.f32 %v3083_v7, %v1704_v50  ;;  %v1782_v26 = vsub.f32 %v3086_v9, %v1704_v50  ;;  %v1783_v35 = vsub.f32 %v3089_v10, %v1708_v62 }
  0xd4   : > { %v1784_v52 = vsub.f32 %v3092_v11, %v1708_v62  ;;  %v1785_v61 = vsub.f32 %v3095_v12, %v1712_v0  ;;  %v1786_v38 = vsub.f32 %v3098_v14, %v1712_v0  ;;  %v1787_v51 = vsub.f32 %v3101_v16, %v3195_v59 }
  0xd5   : > { %v1788_v30 = vsub.f32 %v3104_v18, %v3195_v59  ;;  %v1789_v7 = vsub.f32 %v3107_v19, %v3198_v3  ;;  %v1790_v50 = vsub.f32 %v3110_v22, %v3198_v3  ;;  %v1791_v62 = vsub.f32 %v3113_v25, %v3201_v1 }
  0xd6   : > { %v1792_v9 = vsub.f32 %v3116_v28, %v3201_v1  ;;  %v1793_v10 = vsub.f32 %v3121_v37, %v3204_v2  ;;  %v1794_v11 = vsub.f32 %v3124_v41, %v3204_v2  ;;  %v1795_v59 = vsub.f32 %v3127_v42, %v3207_v63 }
  0xd7   : > { %vm476_vm10 = vcmp.ge.f32.partialorder %v2958_v8, 0.0  ;;  %v1813_v19 = vmul.f32 1.442695, %v1781_v33  ;;  %v1815_v16 = vmul.f32 1.442695, %v1782_v26  ;;  %v4436_v32 = vsub.f32 %v3138_v20, %v3210_v6 }
  0xd8   : > { %v1817_v1 = vmul.f32 1.442695, %v1783_v35  ;;  %v1819_v33 = vmul.f32 1.442695, %v1784_v52  ;;  %v1823_v14 = vmul.f32 1.442695, %v1786_v38 }
  0xd9   : > { %2530 = vpow2.f32 %v1813_v19  ;;  %v3298_v12 = vmul.f32 1.442695, %v1787_v51  ;;  %v3308_v52 = vmul.f32 1.442695, %v1789_v7  ;;  %v3313_v51 = vmul.f32 1.442695, %v1790_v50 }
  0xda   : > { %2532 = vpow2.f32 %v1815_v16  ;;  %v3319_v19 = vmul.f32 1.442695, %v1792_v9  ;;  %v3335_v9 = vmul.f32 1.442695, %v1794_v11  ;;  %v4430_v11 = vsub.f32 %v3130_v43, %v3207_v63 }
  0xdb   : > { %2534 = vpow2.f32 %v1817_v1 }
  0xdc   : > { %v465_v13 = vpop.xlane.xlu0 %464  ;;  %2536 = vpow2.f32 %v1819_v33  ;;  %v3347_v33 = vmul.f32 1.442695, %v1795_v59  ;;  %v4432_v59 = vld [vmem:[#allocation17_spill] sm:$0xff] }
  0xdd   : > { %v477_v18 = vmul.f32 %v465_v13, %v2951_v5 }
  0xde   : > { %4429 = vst [vmem:[#allocation23_spill] sm:$0xff] %v3347_v33 }
  0xe0   : > { %v471_v37 = vpop.xlane.xlu0 %470 }
  0xe1   : > { %v479_v22 = vmul.f32 %v471_v37, %v2951_v5  ;;  %v468_v2 = vpop.xlane.xlu1 %467  ;;  %v1821_v37 = vmul.f32 1.442695, %v1785_v61  ;;  %v3306_v5 = vmul.f32 1.442695, %v1788_v30 }
  0xe2   : > { %v478_v28 = vmul.f32 %v468_v2, %v2958_v8  ;;  %v3317_v2 = vmul.f32 1.442695, %v1791_v62 }
  0xe3   : > { %v481_v13 = vsel %vm475_vm9, %v477_v18, %v479_v22  ;;  %2538 = vpow2.f32 %v1821_v37  ;;  %v3352_v37 = vmul.f32 1.442695, %v4430_v11 }
  0xe4   : > { %v704_v3 = vrot.slane %v481_v13, %v2948_v4  ;;  %v474_v25 = vpop.xlane.xlu0 %473  ;;  %v697_v1 = vcombine.high %v481_v13, %v481_v13  ;;  %2540 = vpow2.f32 %v1823_v14 }
  0xe5   : > { %v480_v26 = vmul.f32 %v474_v25, %v2958_v8  ;;  %v3304_v35 = vpop.permute.xlu1 %303  ;;  %4431 = vst [vmem:[#allocation24_spill] sm:$0xff] %v3352_v37 }
  0xe6   : > { %v712_v61 = vcombine.high %v704_v3, %v704_v3  ;;  %v3311_v38 = vrot.slane %v704_v3, %v2948_v4  ;;  %v3327_v3 = vmul.f32 1.442695, %v1793_v10  ;;  %v665_v10 = vmul.f32 %v3022_v54, %v3304_v35 }
  0xe7   : > { %v482_v18 = vsel %vm476_vm10, %v478_v28, %v480_v26 }
  0xe8   : > { %v753_v30 = vrot.slane %v482_v18, %v2948_v4  ;;  %v3323_v7 = vrot.slane %v712_v61, %v2948_v4  ;;  %v3325_v22 = vpop.permute.xlu0 %307  ;;  %v742_v62 = vcombine.high %v3311_v38, %v3311_v38  ;;  %v746_v26 = vcombine.high %v482_v18, %v482_v18 }
  0xe9   : > { %v666_v50 = vmul.f32 %v3022_v54, %v3325_v22  ;;  %v3331_v8 = vpop.permute.xlu1 %391 }
  0xea   : > { %v761_v16 = vcombine.high %v753_v30, %v753_v30  ;;  %v3338_v25 = vrot.slane %v753_v30, %v2948_v4  ;;  %v802_v28 = vrot.slane %v3323_v7, %v2914_v17  ;;  %v681_v54 = vmul.f32 %v3029_v58, %v3331_v8 }
  0xeb   : > { %v806_v42 = vrot.slane %v742_v62, %v2914_v17 }
  0xec   : > { %v877_v61 = vsub.f32 %v665_v10, %v802_v28  ;;  %v878_v30 = vsub.f32 %v666_v50, %v802_v28  ;;  %v3355_v41 = vrot.slane %v761_v16, %v2948_v4  ;;  %v3357_v0 = vpop.permute.xlu0 %314  ;;  %v791_v43 = vcombine.high %v3338_v25, %v3338_v25 }
  0xed   : > { %v667_v14 = vmul.f32 %v4432_v59, %v3357_v0  ;;  %v3364_v13 = vpop.permute.xlu1 %395  ;;  %v3373_v28 = vrot.slane %v697_v1, %v2948_v4  ;;  %v4434_v10 = vsub.f32 %v3133_v44, %v3210_v6  ;;  %v3390_v1 = vpop.eup %2530 }
  0xee   : > { %v911_v63 = vmul.f32 1.442695, %v877_v61  ;;  %v913_v18 = vmul.f32 1.442695, %v878_v30  ;;  %v834_v50 = vrot.slane %v3355_v41, %v2914_v17  ;;  %v682_v16 = vmul.f32 %v3029_v58, %v3364_v13  ;;  %4438 = vst [vmem:[#allocation27_spill] sm:$0xff] %v3390_v1 }
  0xef   : > { %4433 = vst [vmem:[#allocation17_spill] sm:$0xff] %v3373_v28  ;;  %v879_v62 = vsub.f32 %v667_v14, %v806_v42  ;;  %v3378_v11 = vmul.f32 1.442695, %v4434_v10  ;;  %v3383_v61 = vmul.f32 1.442695, %v4436_v32  ;;  %v3386_v30 = vrot.slane %v746_v26, %v2948_v4  ;;  %v4439_v10 = vld [vmem:[#allocation18_spill] sm:$0xff] }
  0xf0   : > { %2542 = vpow2.f32 %v911_v63  ;;  %v893_v37 = vsub.f32 %v681_v54, %v834_v50  ;;  %v894_v58 = vsub.f32 %v682_v16, %v834_v50  ;;  %v3388_v33 = vpop.permute.xlu0 %402  ;;  %v838_v44 = vrot.slane %v791_v43, %v2914_v17  ;;  %v3400_v54 = vpop.eup %2532 }
  0xf1   : > { %4435 = vst [vmem:[#allocation25_spill] sm:$0xff] %v3378_v11  ;;  %4437 = vst [vmem:[#allocation26_spill] sm:$0xff] %v3386_v30  ;;  %2544 = vpow2.f32 %v913_v18  ;;  %v915_v14 = vmul.f32 1.442695, %v879_v62  ;;  %v683_v11 = vmul.f32 %v4439_v10, %v3388_v33  ;;  %v3395_v20 = vpop.permute.xlu1 %318  ;;  %v744_v18 = vcombine.high %v3323_v7, %v3323_v7  ;;  %v3408_v50 = vpop.eup %2534 }
  0xf2   : > { %v943_v32 = vmul.f32 1.442695, %v893_v37  ;;  %v945_v6 = vmul.f32 1.442695, %v894_v58  ;;  %v668_v26 = vmul.f32 %v4432_v59, %v3395_v20  ;;  %2546 = vpow2.f32 %v3298_v12  ;;  %4440 = vst [vmem:[#allocation18_spill] sm:$0xff] %v3400_v54  ;;  %4442 = vst [vmem:[#allocation29_spill] sm:$0xff] %v3408_v50  ;;  %v3421_v7 = vpop.eup %2536 }
  0xf3   : > { %2548 = vpow2.f32 %v915_v14  ;;  %v895_v63 = vsub.f32 %v683_v11, %v838_v44  ;;  %v3406_v43 = vrot.slane %v3373_v28, %v2948_v4  ;;  %v3414_v12 = vrot.slane %v3386_v30, %v2948_v4  ;;  %4445 = vst [vmem:[#allocation31_spill] sm:$0xff] %v3421_v7  ;;  %v4446_v11 = vld [vmem:[#allocation13_spill] sm:$0xff]  ;;  %v3434_v30 = vpop.eup %2538 }
  0xf4   : > { %2550 = vpow2.f32 %v943_v32  ;;  %v880_v37 = vsub.f32 %v668_v26, %v806_v42  ;;  %v3410_v16 = vpop.permute.xlu0 %292  ;;  %v4444_v59 = vsub.f32 %v3141_v46, %v3213_v29  ;;  %v793_v42 = vcombine.high %v3355_v41, %v3355_v41  ;;  %4448 = vst [vmem:[#allocation13_spill] sm:$0xff] %v3434_v30 }
  0xf5   : > { %4441 = vst [vmem:[#allocation28_spill] sm:$0xff] %v3406_v43  ;;  %4443 = vst [vmem:[#allocation30_spill] sm:$0xff] %v3414_v12  ;;  %2552 = vpow2.f32 %v945_v6  ;;  %v663_v58 = vmul.f32 %v4446_v11, %v3410_v16  ;;  %v3425_v14 = vpop.permute.xlu1 %406  ;;  %v4447_v32 = vsub.f32 %v3144_v48, %v3213_v29  ;;  %v947_v28 = vmul.f32 1.442695, %v895_v63  ;;  %v3450_v29 = vpop.eup %2540 }
  0xf6   : > { %v3419_v62 = vmul.f32 1.442695, %v4444_v59  ;;  %v917_v46 = vmul.f32 1.442695, %v880_v37  ;;  %v798_v59 = vrot.slane %v3311_v38, %v2914_v17  ;;  %v684_v6 = vmul.f32 %v4439_v10, %v3425_v14  ;;  %4449 = vst [vmem:[#allocation32_spill] sm:$0xff] %v3450_v29 }
  0xf7   : > { %v3432_v26 = vmul.f32 1.442695, %v4447_v32  ;;  %2554 = vpow2.f32 %v3306_v5  ;;  %v810_v4 = vrot.slane %v744_v18, %v2914_v17  ;;  %v3444_v41 = vrot.slane %v3338_v25, %v2914_v17  ;;  %v4452_v18 = vld [vmem:[#allocation21_spill] sm:$0xff] }
  0xf8   : > { %v3448_v48 = vrot.slane %v3406_v43, %v2914_v17  ;;  %2556 = vpow2.f32 %v917_v46  ;;  %v896_v38 = vsub.f32 %v684_v6, %v838_v44  ;;  %v3452_v37 = vpop.permute.xlu0 %325  ;;  %v3456_v5 = vrot.slane %v3414_v12, %v2914_v17 }
  0xf9   : > { %v4451_v10 = vsub.f32 %v3147_v49, %v3216_v47  ;;  %v875_v25 = vsub.f32 %v663_v58, %v798_v59  ;;  %v669_v32 = vmul.f32 %v4452_v18, %v3452_v37  ;;  %v3465_v43 = vpop.permute.xlu1 %296  ;;  %v3468_v46 = vrot.slane %v793_v42, %v2914_v17 }
  0xfa   : > { %4450 = vst [vmem:[#allocation33_spill] sm:$0xff] %v3456_v5  ;;  %2558 = vpow2.f32 %v3308_v52  ;;  %v949_v44 = vmul.f32 1.442695, %v896_v38  ;;  %v664_v6 = vmul.f32 %v4446_v11, %v3465_v43  ;;  %v4453_v49 = vsub.f32 %v3152_v34, %v3216_v47 }
  0xfb   : > { %v3461_v63 = vmul.f32 1.442695, %v4451_v10  ;;  %v4454_v58 = vsub.f32 %v3155_v53, %v3219_v31  ;;  %2560 = vpow2.f32 %v947_v28  ;;  %v4455_v42 = vsub.f32 %v3159_v56, %v3219_v31 }
  0xfc   : > { %v3476_v10 = vmul.f32 1.442695, %v4453_v49  ;;  %v4456_v52 = vsub.f32 %v3165_v45, %v3222_v23  ;;  %v4457_v34 = vsub.f32 %v3168_v57, %v3222_v23  ;;  %2562 = vpow2.f32 %v949_v44 }
  0xfd   : > { %v3481_v12 = vmul.f32 1.442695, %v4454_v58  ;;  %v3486_v17 = vmul.f32 1.442695, %v4455_v42  ;;  %v881_v53 = vsub.f32 %v669_v32, %v810_v4  ;;  %v876_v38 = vsub.f32 %v664_v6, %v798_v59  ;;  %v2543_v56 = vpop.eup %2542  ;;  %v3503_v58 = vpop.permute.xlu0 %380 }
  0xfe   : > { %v3491_v11 = vmul.f32 1.442695, %v4456_v52  ;;  %v3496_v47 = vmul.f32 1.442695, %v4457_v34  ;;  %v4458_v28 = vsub.f32 %v3173_v39, %v3225_v36  ;;  %v907_v31 = vmul.f32 1.442695, %v875_v25  ;;  %v3505_v45 = vpop.permute.xlu1 %329  ;;  %v2545_v39 = vpop.eup %2544 }
  0xff   : > { %2564 = vpow2.f32 %v3313_v51  ;;  %v4460_v57 = vsub.f32 %v3176_v60, %v3225_v36  ;;  %v4462_v59 = vsub.f32 %v3179_v21, %v3228_v27  ;;  %v1085_v44 = vmul.f32 %v2543_v56, %v3304_v35  ;;  %v3526_v60 = vpop.eup %2546 }
 0x100   : > { %v3501_v49 = vmul.f32 1.442695, %v4458_v28  ;;  %v909_v25 = vmul.f32 1.442695, %v876_v38  ;;  %v670_v6 = vmul.f32 %v4452_v18, %v3505_v45  ;;  %v4464_v51 = vsub.f32 %v3182_v15, %v3228_v27  ;;  %v2549_v34 = vpop.eup %2548  ;;  %v4468_v18 = vld [vmem:[#allocation14_spill] sm:$0xff] }
 0x101   : > { %v3511_v23 = vmul.f32 1.442695, %v4460_v57  ;;  %v3516_v32 = vmul.f32 1.442695, %v4462_v59  ;;  %v978_v36 = vadd.f32 %v2545_v39, %v2543_v56  ;;  %v1086_v52 = vmul.f32 %v2545_v39, %v3325_v22  ;;  %v2551_v28 = vpop.eup %2550 }
 0x102   : > { %4459 = vst [vmem:[#allocation21_spill] sm:$0xff] %v3501_v49  ;;  %v3524_v42 = vmul.f32 1.442695, %v4464_v51  ;;  %2566 = vpow2.f32 %v3317_v2  ;;  %v4466_v21 = vsub.f32 %v3185_v40, %v3231_v55  ;;  %v919_v38 = vmul.f32 1.442695, %v881_v53  ;;  %v2553_v56 = vpop.eup %2552  ;;  %v3549_v51 = vpop.permute.xlu1 %384 }
 0x103   : > { %4461 = vst [vmem:[#allocation34_spill] sm:$0xff] %v3511_v23  ;;  %4463 = vst [vmem:[#allocation35_spill] sm:$0xff] %v3516_v32  ;;  %2568 = vpow2.f32 %v909_v25  ;;  %v679_v15 = vmul.f32 %v4468_v18, %v3503_v58  ;;  %v882_v27 = vsub.f32 %v670_v6, %v810_v4  ;;  %v979_v57 = vrot.slane %v978_v36, 4 }
 0x104   : > { %4465 = vst [vmem:[#allocation36_spill] sm:$0xff] %v3524_v42  ;;  %v3533_v35 = vmul.f32 1.442695, %v4466_v21  ;;  %v1122_v59 = vadd.f32 %v1086_v52, %v1085_v44  ;;  %2570 = vpow2.f32 %v907_v31  ;;  %v4469_v22 = vsub.f32 %v3188_v24, %v3231_v55  ;;  %v3546_v25 = vpop.eup %2554 }
 0x105   : > { %v1101_v40 = vmul.f32 %v2551_v28, %v3331_v8  ;;  %v921_v39 = vmul.f32 1.442695, %v882_v27  ;;  %2572 = vpow2.f32 %v3319_v19  ;;  %v1877_v53 = vadd.f32 %v3400_v54, %v3390_v1  ;;  %v2557_v8 = vpop.eup %2556 }
 0x106   : > { %4467 = vst [vmem:[#allocation37_spill] sm:$0xff] %v3533_v35  ;;  %v3540_v2 = vmul.f32 1.442695, %v4469_v22  ;;  %v980_v4 = vadd.f32 %v979_v57, %v978_v36  ;;  %v1123_v6 = vrot.slane %v1122_v59, 4  ;;  %v1034_v44 = vadd.f32 %v2553_v56, %v2551_v28 }
 0x107   : > { %v1102_v31 = vmul.f32 %v2553_v56, %v3364_v13  ;;  %2574 = vpow2.f32 %v919_v38  ;;  %v891_v24 = vsub.f32 %v679_v15, %v3444_v41  ;;  %v3554_v55 = vadd.f32 %v3421_v7, %v3408_v50  ;;  %v3561_v13 = vpop.eup %2558  ;;  %v3564_v15 = vpop.permute.xlu0 %413 }
 0x108   : > { %4470 = vst [vmem:[#allocation14_spill] sm:$0xff] %v3540_v2  ;;  %v3558_v19 = vadd.f32 %v3450_v29, %v3434_v30  ;;  %v981_v52 = vrot.slane %v980_v4, 2  ;;  %v1087_v36 = vmul.f32 %v2549_v34, %v3357_v0  ;;  %v1035_v21 = vrot.slane %v1034_v44, 4  ;;  %v2561_v7 = vpop.eup %2560 }
 0x109   : > { %v1178_v27 = vadd.f32 %v1102_v31, %v1101_v40  ;;  %v985_v28 = vadd.f32 %v2557_v8, %v2549_v34  ;;  %v1088_v38 = vmul.f32 %v2557_v8, %v3395_v20  ;;  %2576 = vpow2.f32 %v921_v39  ;;  %v2563_v34 = vpop.eup %2562  ;;  %v4471_v8 = vld [vmem:[#allocation22_spill] sm:$0xff] }
 0x10a   : > { %v680_v57 = vmul.f32 %v4468_v18, %v3549_v51  ;;  %v982_v22 = vadd.f32 %v981_v52, %v980_v4  ;;  %v1124_v56 = vadd.f32 %v1123_v6, %v1122_v59  ;;  %v1036_v29 = vadd.f32 %v1035_v21, %v1034_v44 }
 0x10b   : > { %v1878_v30 = vrot.slane %v1877_v53, 4  ;;  %v986_v50 = vrot.slane %v985_v28, 4  ;;  %v1129_v0 = vadd.f32 %v1088_v38, %v1087_v36  ;;  %2578 = vpow2.f32 %v3327_v3 }
 0x10c   : > { %v983_v31 = vrot.slane %v982_v22, 1  ;;  %v1037_v20 = vrot.slane %v1036_v29, 2  ;;  %v939_v39 = vmul.f32 1.442695, %v891_v24  ;;  %v685_v54 = vmul.f32 %v4471_v8, %v3564_v15  ;;  %v3572_v1 = vpop.eup %2564 }
 0x10d   : > { %v1179_v18 = vrot.slane %v1178_v27, 4  ;;  %v987_v59 = vadd.f32 %v986_v50, %v985_v28  ;;  %v1041_v4 = vadd.f32 %v2563_v34, %v2561_v7  ;;  %v892_v6 = vsub.f32 %v680_v57, %v3444_v41 }
 0x10e   : > { %v1125_v44 = vrot.slane %v1124_v56, 2  ;;  %v1038_v52 = vadd.f32 %v1037_v20, %v1036_v29  ;;  %v1103_v3 = vmul.f32 %v2561_v7, %v3388_v33  ;;  %v1130_v36 = vrot.slane %v1129_v0, 4 }
 0x10f   : > { %v3576_v21 = vpop.eup %2566  ;;  %v984_v38 = vadd.f32 %v983_v31, %v982_v22  ;;  %v988_v40 = vrot.slane %v987_v59, 2  ;;  %v1042_v24 = vrot.slane %v1041_v4, 4  ;;  %v1104_v2 = vmul.f32 %v2563_v34, %v3425_v14 }
 0x110   : > { %v2569_v35 = vpop.eup %2568  ;;  %v1039_v42 = vrot.slane %v1038_v52, 1  ;;  %2580 = vpow2.f32 %v939_v39  ;;  %v897_v50 = vsub.f32 %v685_v54, %v3468_v46  ;;  %v3580_v28 = vadd.f32 %v1878_v30, %v1877_v53 }
 0x111   : > { %v2571_v41 = vpop.eup %2570  ;;  %v1180_v57 = vadd.f32 %v1179_v18, %v1178_v27  ;;  %v989_v29 = vadd.f32 %v988_v40, %v987_v59  ;;  %v1043_v20 = vadd.f32 %v1042_v24, %v1041_v4  ;;  %v1185_v33 = vadd.f32 %v1104_v2, %v1103_v3  ;;  %v3586_v59 = vpop.permute.xlu0 %336 }
 0x112   : > { %v3582_v7 = vpop.eup %2572  ;;  %v1040_v32 = vadd.f32 %v1039_v42, %v1038_v52  ;;  %v1131_v22 = vadd.f32 %v1130_v36, %v1129_v0  ;;  %v971_v31 = vadd.f32 %v2571_v41, %v2569_v35  ;;  %v941_v23 = vmul.f32 1.442695, %v892_v6 }
 0x113   : > { %v1126_v49 = vadd.f32 %v1125_v44, %v1124_v56  ;;  %2582 = vrcp.f32 %v984_v38  ;;  %v990_v14 = vrot.slane %v989_v29, 1  ;;  %v1044_v34 = vrot.slane %v1043_v20, 2  ;;  %v3592_v38 = vpop.permute.xlu1 %417 }
 0x114   : > { %v2575_v39 = vpop.eup %2574  ;;  %2584 = vrcp.f32 %v1040_v32  ;;  %v1083_v30 = vmul.f32 %v2571_v41, %v3410_v16  ;;  %v972_v54 = vrot.slane %v971_v31, 4  ;;  %v1084_v53 = vmul.f32 %v2569_v35, %v3465_v43 }
 0x115   : > { %v1181_v27 = vrot.slane %v1180_v57, 2  ;;  %v991_v40 = vadd.f32 %v990_v14, %v989_v29  ;;  %v1045_v2 = vadd.f32 %v1044_v34, %v1043_v20  ;;  %v1186_v18 = vrot.slane %v1185_v33, 4  ;;  %v4472_v29 = vld [vmem:[#allocation19_spill] sm:$0xff] }
 0x116   : > { %v2577_v42 = vpop.eup %2576  ;;  %v1132_v0 = vrot.slane %v1131_v22, 2  ;;  %v973_v4 = vadd.f32 %v972_v54, %v971_v31  ;;  %v1115_v56 = vadd.f32 %v1084_v53, %v1083_v30  ;;  %v951_v6 = vmul.f32 1.442695, %v897_v50 }
 0x117   : > { %v1127_v44 = vrot.slane %v1126_v49, 1  ;;  %2586 = vrcp.f32 %v991_v40  ;;  %v1046_v52 = vrot.slane %v1045_v2, 1  ;;  %v1089_v32 = vmul.f32 %v2575_v39, %v3452_v37 }
 0x118   : > { %v3589_v16 = vpop.eup %2578  ;;  %v974_v3 = vrot.slane %v973_v4, 2  ;;  %v1116_v43 = vrot.slane %v1115_v56, 4  ;;  %v992_v35 = vadd.f32 %v2577_v42, %v2575_v39  ;;  %v1090_v36 = vmul.f32 %v2577_v42, %v3505_v45  ;;  %v3599_v45 = vpop.permute.xlu0 %424 }
 0x119   : > { %v1182_v24 = vadd.f32 %v1181_v27, %v1180_v57  ;;  %v1187_v41 = vadd.f32 %v1186_v18, %v1185_v33  ;;  %2588 = vpow2.f32 %v941_v23  ;;  %v671_v50 = vmul.f32 %v4472_v29, %v3586_v59 }
 0x11a   : > { %v1133_v20 = vadd.f32 %v1132_v0, %v1131_v22  ;;  %v975_v31 = vadd.f32 %v974_v3, %v973_v4  ;;  %v993_v14 = vrot.slane %v992_v35, 4  ;;  %v1136_v34 = vadd.f32 %v1090_v36, %v1089_v32  ;;  %v4473_v4 = vld [vmem:[#allocation20_spill] sm:$0xff] }
 0x11b   : > { %v1047_v37 = vadd.f32 %v1046_v52, %v1045_v2  ;;  %v1117_v30 = vadd.f32 %v1116_v43, %v1115_v56  ;;  %v883_v54 = vsub.f32 %v671_v50, %v3448_v48  ;;  %v686_v39 = vmul.f32 %v4471_v8, %v3592_v38  ;;  %v3605_v8 = vpop.permute.xlu1 %340 }
 0x11c   : > { %v976_v53 = vrot.slane %v975_v31, 1  ;;  %v994_v57 = vadd.f32 %v993_v14, %v992_v35  ;;  %v1137_v33 = vrot.slane %v1136_v34, 4  ;;  %2590 = vpow2.f32 %v951_v6 }
 0x11d   : > { %v2581_v23 = vpop.eup %2580  ;;  %v1183_v27 = vrot.slane %v1182_v24, 1  ;;  %v1188_v40 = vrot.slane %v1187_v41, 2  ;;  %v898_v22 = vsub.f32 %v686_v39, %v3468_v46  ;;  %v1880_v18 = vrot.slane %v3580_v28, 2 }
 0x11e   : > { %v977_v2 = vadd.f32 %v976_v53, %v975_v31  ;;  %v995_v42 = vrot.slane %v994_v57, 2  ;;  %v923_v0 = vmul.f32 1.442695, %v883_v54  ;;  %v687_v56 = vmul.f32 %v4473_v4, %v3599_v45 }
 0x11f   : > { %2592 = vrcp.f32 %v1047_v37  ;;  %v1118_v52 = vrot.slane %v1117_v30, 2  ;;  %v1138_v32 = vadd.f32 %v1137_v33, %v1136_v34  ;;  %v953_v3 = vmul.f32 1.442695, %v898_v22 }
 0x120   : > { %v2583_v6 = vpop.eup %2582  ;;  %v1128_v43 = vadd.f32 %v1127_v44, %v1126_v49  ;;  %v1134_v35 = vrot.slane %v1133_v20, 1  ;;  %2594 = vrcp.f32 %v977_v2  ;;  %v996_v36 = vadd.f32 %v995_v42, %v994_v57 }
 0x121   : > { %v2585_v46 = vpop.eup %2584  ;;  %v1189_v50 = vadd.f32 %v1188_v40, %v1187_v41  ;;  %v1139_v14 = vrot.slane %v1138_v32, 2  ;;  %2596 = vpow2.f32 %v953_v3  ;;  %v672_v31 = vmul.f32 %v4472_v29, %v3605_v8 }
 0x122   : > { %v1184_v54 = vadd.f32 %v1183_v27, %v1182_v24  ;;  %v997_v39 = vrot.slane %v996_v36, 1  ;;  %2598 = vpow2.f32 %v923_v0  ;;  %v899_v37 = vsub.f32 %v687_v56, %v3456_v5 }
 0x123   : > { %v1230_v53 = vmul.f32 %v2583_v6, %v1128_v43  ;;  %v1119_v34 = vadd.f32 %v1118_v52, %v1117_v30  ;;  %v884_v33 = vsub.f32 %v672_v31, %v3448_v48  ;;  %2600 = vpow2.f32 %v3335_v9  ;;  %v4475_v9 = vld [vmem:[#allocation9_spill] sm:$0xff]  ;;  %v4477_v43 = vld [vmem:[#allocation10_spill] sm:$0xff] }
 0x124   : > { %v2587_v49 = vpop.eup %2586  ;;  %v1246_v44 = vmul.f32 %v2585_v46, %v1184_v54  ;;  %v1135_v57 = vadd.f32 %v1134_v35, %v1133_v20  ;;  %v998_v41 = vadd.f32 %v997_v39, %v996_v36  ;;  %v4474_v40 = vrot.slane %v3554_v55, 4 }
 0x125   : > { %v1190_v29 = vrot.slane %v1189_v50, 1  ;;  %v1099_v24 = vmul.f32 %v2581_v23, %v3503_v58  ;;  %v1140_v27 = vadd.f32 %v1139_v14, %v1138_v32  ;;  %v925_v2 = vmul.f32 1.442695, %v884_v33  ;;  %v4480_v33 = vld [vmem:[#allocation23_spill] sm:$0xff] }
 0x126   : > { %v1886_v22 = vadd.f32 %v4474_v40, %v3554_v55  ;;  %v2589_v42 = vpop.eup %2588  ;;  %v1232_v0 = vmul.f32 %v2587_v49, %v1135_v57  ;;  %2602 = vrcp.f32 %v998_v41  ;;  %v955_v30 = vmul.f32 1.442695, %v899_v37  ;;  %v4481_v57 = vld [vmem:[#allocation24_spill] sm:$0xff] }
 0x127   : > { %v1881_v48 = vadd.f32 %v1880_v18, %v3580_v28  ;;  %v4476_v56 = vrot.slane %v4475_v9, 1  ;;  %v1120_v20 = vrot.slane %v1119_v34, 1  ;;  %v1027_v3 = vadd.f32 %v2589_v42, %v2581_v23 }
 0x128   : > { %v1100_v6 = vmul.f32 %v2589_v42, %v3549_v51  ;;  %v4478_v55 = vrot.slane %v4477_v43, 1  ;;  %2604 = vpow2.f32 %v925_v2  ;;  %v1892_v58 = vrot.slane %v3558_v19, 4 }
 0x129   : > { %v1292_v52 = vmul.f32 %v4476_v56, %v1230_v53  ;;  %v1898_v32 = vadd.f32 %v3546_v25, %v3526_v60  ;;  %v2591_v36 = vpop.eup %2590  ;;  %v1191_v46 = vadd.f32 %v1190_v29, %v1189_v50  ;;  %v1141_v28 = vrot.slane %v1140_v27, 1 }
 0x12a   : > { %v3622_v35 = vmul.f32 %v4478_v55, %v1246_v44  ;;  %v1028_v18 = vrot.slane %v1027_v3, 4  ;;  %v1171_v14 = vadd.f32 %v1100_v6, %v1099_v24  ;;  %v4479_v23 = vrot.slane %v4475_v9, 2 }
 0x12b   : > { %2606 = vpow2.f32 %v955_v30  ;;  %v1882_v51 = vrot.slane %v1881_v48, 1  ;;  %v1887_v54 = vrot.slane %v1886_v22, 2  ;;  %v1323_v39 = vrot.slane %v1292_v52, 7 }
 0x12c   : > { %v1293_v31 = vmul.f32 %v4479_v23, %v1232_v0  ;;  %v1121_v37 = vadd.f32 %v1120_v20, %v1119_v34  ;;  %v1029_v53 = vadd.f32 %v1028_v18, %v1027_v3  ;;  %2608 = vpow2.f32 %v4480_v33  ;;  %v2593_v49 = vpop.eup %2592 }
 0x12d   : > { %v1344_v44 = vrot.slane %v3622_v35, 7  ;;  %v1105_v50 = vmul.f32 %v2591_v36, %v3564_v15  ;;  %2610 = vpow2.f32 %v4481_v57  ;;  %v1893_v41 = vadd.f32 %v1892_v58, %v3558_v19  ;;  %v2595_v40 = vpop.eup %2594  ;;  %v4482_v15 = vld [vmem:[#allocation25_spill] sm:$0xff] }
 0x12e   : > { %v1142_v29 = vadd.f32 %v1141_v28, %v1140_v27  ;;  %v1030_v24 = vrot.slane %v1029_v53, 2  ;;  %v1172_v2 = vrot.slane %v1171_v14, 4  ;;  %v1899_v42 = vrot.slane %v1898_v32, 4  ;;  %v2597_v0 = vpop.eup %2596  ;;  %v2722_v19 = vld [vmem:[%s4363_s2] sm:$0xff] }
 0x12f   : > { %v1326_v30 = vrot.slane %v1293_v31, 6  ;;  %v1228_v34 = vmul.f32 %v2595_v40, %v1121_v37  ;;  %v3634_v56 = vadd.f32 %v1882_v51, %v1881_v48  ;;  %v1888_v52 = vadd.f32 %v1887_v54, %v1886_v22  ;;  %v2599_v20 = vpop.eup %2598 }
 0x130   : > { %v1248_v3 = vmul.f32 %v2593_v49, %v1191_v46  ;;  %v1031_v6 = vadd.f32 %v1030_v24, %v1029_v53  ;;  %v1048_v55 = vadd.f32 %v2597_v0, %v2591_v36  ;;  %2612 = vpow2.f32 %v4482_v15  ;;  %v3637_v18 = vpop.eup %2600 }
 0x131   : > { %v1291_v27 = vmul.f32 %v2722_v19, %v1228_v34  ;;  %v1106_v58 = vmul.f32 %v2597_v0, %v3592_v38  ;;  %2614 = vpow2.f32 %v3383_v61  ;;  %v1894_v48 = vrot.slane %v1893_v41, 2 }
 0x132   : > { %v1032_v22 = vrot.slane %v1031_v6, 1  ;;  %v1173_v28 = vadd.f32 %v1172_v2, %v1171_v14  ;;  %2616 = vpow2.f32 %v3419_v62  ;;  %v1900_v36 = vadd.f32 %v1899_v42, %v1898_v32 }
 0x133   : > { %v1325_v46 = vsel %vm1324_vm11, %v1323_v39, %v1291_v27  ;;  %v1091_v23 = vmul.f32 %v2599_v20, %v3586_v59  ;;  %2618 = vpow2.f32 %v3432_v26  ;;  %v1889_v31 = vrot.slane %v1888_v52, 1  ;;  %v2603_v51 = vpop.eup %2602 }
 0x134   : > { %v1328_v54 = vsel %vm1327_vm12, %v1326_v30, %v1325_v46  ;;  %v1033_v38 = vadd.f32 %v1032_v22, %v1031_v6  ;;  %v1049_v37 = vrot.slane %v1048_v55, 4  ;;  %2620 = vpow2.f32 %v3461_v63 }
 0x135   : > { %v1234_v61 = vmul.f32 %v2603_v51, %v1142_v29  ;;  %v1192_v53 = vadd.f32 %v1106_v58, %v1105_v50  ;;  %2622 = vpow2.f32 %v3476_v10  ;;  %v1895_v62 = vadd.f32 %v1894_v48, %v1893_v41  ;;  %v2605_v32 = vpop.eup %2604  ;;  %v4488_v58 = vld [vmem:[#allocation21_spill] sm:$0xff] }
 0x136   : > { %v1174_v14 = vrot.slane %v1173_v28, 2  ;;  %2624 = vrcp.f32 %v1033_v38  ;;  %v1901_v39 = vrot.slane %v1900_v36, 2  ;;  %v1905_v26 = vadd.f32 %v3572_v1, %v3561_v13 }
 0x137   : > { %v4483_v59 = vrot.slane %v4475_v9, 3  ;;  %v999_v49 = vadd.f32 %v2605_v32, %v2599_v20  ;;  %v1092_v57 = vmul.f32 %v2605_v32, %v3605_v8  ;;  %2626 = vpow2.f32 %v3481_v12 }
 0x138   : > { %v3657_v63 = vpop.eup %2606  ;;  %v4485_v10 = vrot.slane %v4477_v43, 2  ;;  %v1050_v41 = vadd.f32 %v1049_v37, %v1048_v55  ;;  %2628 = vpow2.f32 %v3486_v17  ;;  %v3664_v40 = vadd.f32 %v1889_v31, %v1888_v52  ;;  %v4489_v31 = vld [vmem:[#allocation34_spill] sm:$0xff] }
 0x139   : > { %v1294_v33 = vmul.f32 %v4483_v59, %v1234_v61  ;;  %4484 = vst [vmem:[#allocation22_spill] sm:$0xff] %v3657_v63  ;;  %v3666_v29 = vpop.eup %2608  ;;  %v1193_v2 = vrot.slane %v1192_v53, 4  ;;  %v1000_v42 = vrot.slane %v999_v49, 4  ;;  %v1143_v0 = vadd.f32 %v1092_v57, %v1091_v23  ;;  %v4491_v61 = vld [vmem:[#allocation35_spill] sm:$0xff] }
 0x13a   : > { %v3661_v50 = vmul.f32 %v4485_v10, %v1248_v3  ;;  %v3668_v8 = vpop.eup %2610  ;;  %v1175_v12 = vadd.f32 %v1174_v14, %v1173_v28  ;;  %2630 = vpow2.f32 %v3491_v11  ;;  %v1906_v30 = vrot.slane %v1905_v26, 4 }
 0x13b   : > { %v1329_v24 = vrot.slane %v1294_v33, 5  ;;  %v1912_v43 = vadd.f32 %v3582_v7, %v3576_v21  ;;  %v1001_v17 = vadd.f32 %v1000_v42, %v999_v49  ;;  %v1896_v52 = vrot.slane %v1895_v62, 1  ;;  %v4493_v49 = vld [vmem:[#allocation37_spill] sm:$0xff] }
 0x13c   : > { %v1902_v20 = vadd.f32 %v1901_v39, %v1900_v36  ;;  %v1346_v3 = vrot.slane %v3661_v50, 6  ;;  %v1051_v6 = vrot.slane %v1050_v41, 2  ;;  %v1144_v55 = vrot.slane %v1143_v0, 4 }
 0x13d   : > { %v3674_v34 = vsel %vm1330_vm13, %v1329_v24, %v1328_v54  ;;  %2632 = vpow2.f32 %v3496_v47  ;;  %v3678_v15 = vpop.eup %2612  ;;  %v1194_v19 = vadd.f32 %v1193_v2, %v1192_v53  ;;  %v3682_v11 = vmul.f32 %v3657_v63, %v3599_v45  ;;  %v4494_v2 = vld [vmem:[#allocation14_spill] sm:$0xff] }
 0x13e   : > { %4486 = vst [vmem:[#allocation19_spill] sm:$0xff] %v3674_v34  ;;  %v1002_v27 = vrot.slane %v1001_v17, 2  ;;  %2634 = vpow2.f32 %v4488_v58  ;;  %v3685_v48 = vpop.eup %2614  ;;  %v1176_v22 = vrot.slane %v1175_v12, 1  ;;  %v1907_v28 = vadd.f32 %v1906_v30, %v1905_v26  ;;  %v4492_v26 = vld [vmem:[#allocation36_spill] sm:$0xff] }
 0x13f   : > { %4487 = vst [vmem:[#allocation10_spill] sm:$0xff] %v3682_v11  ;;  %v1913_v36 = vrot.slane %v1912_v43, 4  ;;  %v1919_v46 = vadd.f32 %v3637_v18, %v3589_v16  ;;  %v3689_v23 = vpop.eup %2616  ;;  %2636 = vpow2.f32 %v4489_v31  ;;  %v3692_v51 = vadd.f32 %v1896_v52, %v1895_v62 }
 0x140   : > { %v1003_v47 = vadd.f32 %v1002_v27, %v1001_v17  ;;  %v1903_v45 = vrot.slane %v1902_v20, 1  ;;  %v3694_v54 = vpop.eup %2618  ;;  %v1052_v38 = vadd.f32 %v1051_v6, %v1050_v41  ;;  %v1145_v37 = vadd.f32 %v1144_v55, %v1143_v0 }
 0x141   : > { %4490 = vst [vmem:[#allocation23_spill] sm:$0xff] %v3692_v51  ;;  %2638 = vpow2.f32 %v4491_v61  ;;  %v1920_v53 = vrot.slane %v1919_v46, 4  ;;  %v3697_v32 = vpop.eup %2620  ;;  %v1195_v14 = vrot.slane %v1194_v19, 2  ;;  %v1926_v59 = vadd.f32 %v3668_v8, %v3666_v29 }
 0x142   : > { %v1004_v39 = vrot.slane %v1003_v47, 1  ;;  %2640 = vpow2.f32 %v4492_v26  ;;  %v3702_v33 = vpop.eup %2622  ;;  %v1177_v62 = vadd.f32 %v1176_v22, %v1175_v12  ;;  %v1908_v57 = vrot.slane %v1907_v28, 2 }
 0x143   : > { %2642 = vpow2.f32 %v4493_v49  ;;  %v1914_v10 = vadd.f32 %v1913_v36, %v1912_v43  ;;  %v2625_v41 = vpop.eup %2624  ;;  %v3706_v42 = vadd.f32 %v1903_v45, %v1902_v20  ;;  %v1927_v0 = vrot.slane %v1926_v59, 4  ;;  %v3721_v20 = vld [vmem:[%s4363_s2 + $0x8] sm:$0xff] }
 0x144   : > { %v1005_v24 = vadd.f32 %v1004_v39, %v1003_v47  ;;  %2644 = vpow2.f32 %v4494_v2  ;;  %v3708_v30 = vpop.eup %2626  ;;  %v1244_v17 = vmul.f32 %v2625_v41, %v1177_v62  ;;  %v1146_v52 = vrot.slane %v1145_v37, 2  ;;  %4497 = vst [vmem:[#allocation21_spill] sm:$0xff] %v3721_v20 }
 0x145   : > { %4495 = vst [vmem:[#allocation24_spill] sm:$0xff] %v3706_v42  ;;  %v1921_v6 = vadd.f32 %v1920_v53, %v1919_v46  ;;  %v1933_v55 = vadd.f32 %v3685_v48, %v3678_v15  ;;  %v3712_v12 = vpop.eup %2628  ;;  %v1053_v27 = vrot.slane %v1052_v38, 1  ;;  %v3714_v58 = vadd.f32 %v1195_v14, %v1194_v19 }
 0x146   : > { %v1928_v43 = vadd.f32 %v1927_v0, %v1926_v59  ;;  %v1940_v22 = vadd.f32 %v3694_v54, %v3689_v23  ;;  %v1299_v36 = vmul.f32 %v3721_v20, %v1244_v17  ;;  %v1909_v46 = vadd.f32 %v1908_v57, %v1907_v28 }
 0x147   : > { %4496 = vst [vmem:[#allocation25_spill] sm:$0xff] %v3714_v58  ;;  %v1915_v47 = vrot.slane %v1914_v10, 2  ;;  %v1934_v31 = vrot.slane %v1933_v55, 4  ;;  %v3724_v45 = vpop.eup %2630  ;;  %2646 = vrcp.f32 %v1005_v24  ;;  %v1947_v19 = vadd.f32 %v3702_v33, %v3697_v32 }
 0x148   : > { %v1941_v61 = vrot.slane %v1940_v22, 4  ;;  %v1954_v53 = vadd.f32 %v3712_v12, %v3708_v30  ;;  %v1345_v14 = vsel %vm1324_vm11, %v1344_v44, %v1299_v36  ;;  %v1147_v39 = vadd.f32 %v1146_v52, %v1145_v37 }
 0x149   : > { %v1922_v26 = vrot.slane %v1921_v6, 2  ;;  %v1935_v59 = vadd.f32 %v1934_v31, %v1933_v55  ;;  %v3738_v62 = vsel %vm1327_vm12, %v1346_v3, %v1345_v14  ;;  %v1929_v49 = vrot.slane %v1928_v43, 2 }
 0x14a   : > { %v3733_v28 = vpop.eup %2632  ;;  %4498 = vst [vmem:[#allocation34_spill] sm:$0xff] %v3738_v62  ;;  %v1942_v57 = vadd.f32 %v1941_v61, %v1940_v22  ;;  %v1948_v41 = vrot.slane %v1947_v19, 4  ;;  %v3742_v2 = vadd.f32 %v1053_v27, %v1052_v38  ;;  %v1955_v0 = vrot.slane %v1954_v53, 4 }
 0x14b   : > { %v3740_v24 = vpop.eup %2634  ;;  %v1936_v35 = vrot.slane %v1935_v59, 2  ;;  %v1961_v44 = vadd.f32 %v3733_v28, %v3724_v45  ;;  %v1916_v17 = vadd.f32 %v1915_v47, %v1914_v10  ;;  %v1910_v3 = vrot.slane %v1909_v46, 1 }
 0x14c   : > { %4499 = vst [vmem:[#allocation35_spill] sm:$0xff] %v3742_v2  ;;  %v1943_v52 = vrot.slane %v1942_v57, 2  ;;  %v1949_v50 = vadd.f32 %v1948_v41, %v1947_v19  ;;  %v3747_v55 = vpop.eup %2636  ;;  %v1923_v36 = vadd.f32 %v1922_v26, %v1921_v6  ;;  %v1956_v22 = vadd.f32 %v1955_v0, %v1954_v53 }
 0x14d   : > { %v1962_v31 = vrot.slane %v1961_v44, 4  ;;  %v1148_v38 = vrot.slane %v1147_v39, 1  ;;  %v1930_v27 = vadd.f32 %v1929_v49, %v1928_v43  ;;  %v1968_v62 = vadd.f32 %v3747_v55, %v3740_v24 }
 0x14e   : > { %v3749_v61 = vpop.eup %2638  ;;  %v1950_v14 = vrot.slane %v1949_v50, 2  ;;  %v1937_v37 = vadd.f32 %v1936_v35, %v1935_v59  ;;  %v1944_v10 = vadd.f32 %v1943_v52, %v1942_v57  ;;  %v1957_v47 = vrot.slane %v1956_v22, 2 }
 0x14f   : > { %v3753_v34 = vpop.eup %2640  ;;  %v1963_v19 = vadd.f32 %v1962_v31, %v1961_v44  ;;  %v1917_v58 = vrot.slane %v1916_v17, 1  ;;  %v1969_v53 = vrot.slane %v1968_v62, 4  ;;  %v3761_v43 = vadd.f32 %v1910_v3, %v1909_v46 }
 0x150   : > { %v3755_v41 = vpop.eup %2642  ;;  %v1951_v6 = vadd.f32 %v1950_v14, %v1949_v50  ;;  %v1975_v26 = vadd.f32 %v3753_v34, %v3749_v61  ;;  %v1924_v49 = vrot.slane %v1923_v36, 1  ;;  %v1958_v20 = vadd.f32 %v1957_v47, %v1956_v22 }
 0x151   : > { %v3759_v0 = vpop.eup %2644  ;;  %4500 = vst [vmem:[#allocation36_spill] sm:$0xff] %v3761_v43  ;;  %v1964_v9 = vrot.slane %v1963_v19, 2  ;;  %v1149_v2 = vadd.f32 %v1148_v38, %v1147_v39  ;;  %v1931_v59 = vrot.slane %v1930_v27, 1  ;;  %v1970_v57 = vadd.f32 %v1969_v53, %v1968_v62  ;;  %v4503_v39 = vld [vmem:[#allocation7_spill] sm:$0xff] }
 0x152   : > { %v1976_v35 = vrot.slane %v1975_v26, 4  ;;  %v1938_v44 = vrot.slane %v1937_v37, 1  ;;  %v1945_v52 = vrot.slane %v1944_v10, 1  ;;  %v1982_v50 = vadd.f32 %v3759_v0, %v3755_v41  ;;  %v4504_v38 = vld [vmem:[#allocation27_spill] sm:$0xff] }
 0x153   : > { %v1965_v31 = vadd.f32 %v1964_v9, %v1963_v19  ;;  %v3765_v14 = vadd.f32 %v1917_v58, %v1916_v17  ;;  %v1952_v11 = vrot.slane %v1951_v6, 1  ;;  %v1971_v63 = vrot.slane %v1970_v57, 2  ;;  %v4505_v9 = vld [vmem:[#allocation6_spill] sm:$0xff] }
 0x154   : > { %v1977_v5 = vadd.f32 %v1976_v35, %v1975_v26  ;;  %v2647_v46 = vpop.eup %2646  ;;  %v3767_v3 = vadd.f32 %v1924_v49, %v1923_v36  ;;  %v1959_v22 = vrot.slane %v1958_v20, 1  ;;  %v1983_v47 = vrot.slane %v1982_v50, 4  ;;  %v4506_v19 = vld [vmem:[#allocation18_spill] sm:$0xff] }
 0x155   : > { %4501 = vst [vmem:[#allocation37_spill] sm:$0xff] %v3765_v14  ;;  %v1989_v62 = vmul.f32 %v4504_v38, %v4503_v39  ;;  %v1966_v53 = vrot.slane %v1965_v31, 1  ;;  %v1972_v4 = vadd.f32 %v1971_v63, %v1970_v57  ;;  %v1990_v42 = vmul.f32 %v4506_v19, %v4505_v9  ;;  %v4508_v57 = vld [vmem:[#allocation29_spill] sm:$0xff] }
 0x156   : > { %4502 = vst [vmem:[#allocation14_spill] sm:$0xff] %v3767_v3  ;;  %v1978_v43 = vrot.slane %v1977_v5, 2  ;;  %v3773_v51 = vadd.f32 %v1931_v59, %v1930_v27  ;;  %v3775_v58 = vadd.f32 %v1938_v44, %v1937_v37  ;;  %v3777_v17 = vadd.f32 %v1945_v52, %v1944_v10  ;;  %v4509_v27 = vld [vmem:[#allocation31_spill] sm:$0xff]  ;;  %v4510_v44 = vld [vmem:[#allocation13_spill] sm:$0xff] }
 0x157   : > { %v1984_v26 = vadd.f32 %v1983_v47, %v1982_v50  ;;  %v3779_v36 = vmul.f32 %v2647_v46, %v1149_v2  ;;  %v3781_v49 = vadd.f32 %v1952_v11, %v1951_v6  ;;  %v1973_v35 = vrot.slane %v1972_v4, 1  ;;  %v4511_v11 = vld [vmem:[#allocation32_spill] sm:$0xff] }
 0x158   : > { %v1979_v3 = vadd.f32 %v1978_v43, %v1977_v5  ;;  %v3783_v38 = vadd.f32 %v1959_v22, %v1958_v20  ;;  %v1991_v14 = vmul.f32 %v4508_v57, %v4503_v39  ;;  %v1992_v59 = vmul.f32 %v4509_v27, %v4505_v9 }
 0x159   : > { %4507 = vst [vmem:[#allocation7_spill] sm:$0xff] %v3779_v36  ;;  %v1985_v63 = vrot.slane %v1984_v26, 2  ;;  %v3789_v37 = vadd.f32 %v1966_v53, %v1965_v31  ;;  %v1993_v2 = vmul.f32 %v4510_v44, %v4503_v39  ;;  %v1994_v6 = vmul.f32 %v4511_v11, %v4505_v9 }
 0x15a   : > { %v1980_v10 = vrot.slane %v1979_v3, 1  ;;  %v1995_v5 = vmul.f32 %v3526_v60, %v4503_v39  ;;  %v1996_v20 = vmul.f32 %v3546_v25, %v4505_v9  ;;  %v1997_v43 = vmul.f32 %v3561_v13, %v4503_v39 }
 0x15b   : > { %v1986_v52 = vadd.f32 %v1985_v63, %v1984_v26  ;;  %v3801_v50 = vadd.f32 %v1973_v35, %v1972_v4  ;;  %v1998_v31 = vmul.f32 %v3572_v1, %v4505_v9  ;;  %v1999_v46 = vmul.f32 %v3576_v21, %v4503_v39 }
 0x15c   : > { %v2000_v22 = vmul.f32 %v3582_v7, %v4505_v9  ;;  %v2001_v60 = vmul.f32 %v3589_v16, %v4503_v39  ;;  %v2002_v25 = vmul.f32 %v3637_v18, %v4505_v9  ;;  %v2003_v13 = vmul.f32 %v3666_v29, %v4503_v39 }
 0x15d   : > { %v1987_v47 = vrot.slane %v1986_v52, 1  ;;  %v3815_v4 = vadd.f32 %v1980_v10, %v1979_v3  ;;  %v2004_v1 = vmul.f32 %v3668_v8, %v4505_v9  ;;  %v3821_v21 = vmul.f32 %v3678_v15, %v4503_v39 }
 0x15e   : > { %v3825_v7 = vmul.f32 %v3685_v48, %v4505_v9  ;;  %v3829_v16 = vmul.f32 %v3689_v23, %v4503_v39  ;;  %v3833_v18 = vmul.f32 %v3694_v54, %v4505_v9  ;;  %v3837_v29 = vmul.f32 %v3697_v32, %v4503_v39 }
 0x15f   : > { %v3841_v8 = vmul.f32 %v3702_v33, %v4505_v9  ;;  %v3843_v15 = vadd.f32 %v1987_v47, %v1986_v52  ;;  %v3847_v48 = vmul.f32 %v3708_v30, %v4503_v39  ;;  %v3851_v23 = vmul.f32 %v3712_v12, %v4505_v9 }
 0x160   : > { %v3855_v54 = vmul.f32 %v3724_v45, %v4503_v39  ;;  %v2021_v32 = vadd.f32 %v1990_v42, %v1989_v62  ;;  %v2028_v3 = vadd.f32 %v1992_v59, %v1991_v14  ;;  %v2035_v53 = vadd.f32 %v1994_v6, %v1993_v2 }
 0x161   : > { %4512 = vst [vmem:[#allocation27_spill] sm:$0xff] %v3843_v15  ;;  %v2042_v19 = vadd.f32 %v1996_v20, %v1995_v5  ;;  %v2049_v33 = vadd.f32 %v1998_v31, %v1997_v43  ;;  %v2056_v26 = vadd.f32 %v2000_v22, %v1999_v46  ;;  %v2063_v35 = vadd.f32 %v2002_v25, %v2001_v60  ;;  %v2297_v43 = vld [vmem:[%s4364_s3 + $0xf8] sm:$0xff] }
 0x162   : > { %v2070_v63 = vadd.f32 %v2004_v1, %v2003_v13  ;;  %v2022_v57 = vrot.slane %v2021_v32, 4  ;;  %v2029_v27 = vrot.slane %v2028_v3, 4  ;;  %v2036_v30 = vrot.slane %v2035_v53, 4  ;;  %v2281_v31 = vld [vmem:[%s4364_s3 + $0x78] sm:$0xff]  ;;  %2448 = vmatprep.subr.mxu0 %v2297_v43  ;;  %v2296_v13 = vld [vmem:[%s4364_s3 + $0xf0] sm:$0xff] }
 0x163   : > { %v2043_v10 = vrot.slane %v2042_v19, 4  ;;  %v2050_v44 = vrot.slane %v2049_v33, 4  ;;  %v2057_v11 = vrot.slane %v2056_v26, 4  ;;  %v2064_v12 = vrot.slane %v2063_v35, 4  ;;  %v2280_v1 = vld [vmem:[%s4364_s3 + $0x70] sm:$0xff]  ;;  %2449 = vmatpush3.msra.mxu0 %v2281_v31 }
 0x164   : > { %v2071_v52 = vrot.slane %v2070_v63, 4  ;;  %v2023_v47 = vadd.f32 %v2022_v57, %v2021_v32  ;;  %v2030_v36 = vadd.f32 %v2029_v27, %v2028_v3  ;;  %v2037_v45 = vadd.f32 %v2036_v30, %v2035_v53  ;;  %2450 = vmatprep.subr.mxu0 %v2296_v13 }
 0x165   : > { %v2044_v15 = vadd.f32 %v2043_v10, %v2042_v19  ;;  %v2051_v42 = vadd.f32 %v2050_v44, %v2049_v33  ;;  %v2058_v14 = vadd.f32 %v2057_v11, %v2056_v26  ;;  %v2065_v62 = vadd.f32 %v2064_v12, %v2063_v35  ;;  %v2295_v33 = vld [vmem:[%s4364_s3 + $0xe8] sm:$0xff]  ;;  %2451 = vmatpush3.msra.mxu0 %v2280_v1  ;;  %v2294_v44 = vld [vmem:[%s4364_s3 + $0xe0] sm:$0xff] }
 0x166   : > { %v2072_v59 = vadd.f32 %v2071_v52, %v2070_v63  ;;  %v2024_v2 = vrot.slane %v2023_v47, 2  ;;  %v2031_v6 = vrot.slane %v2030_v36, 2  ;;  %v2038_v5 = vrot.slane %v2037_v45, 2  ;;  %2452 = vmatprep.subr.mxu0 %v2295_v33 }
 0x167   : > { %v2045_v20 = vrot.slane %v2044_v15, 2  ;;  %v2052_v46 = vrot.slane %v2051_v42, 2  ;;  %v2059_v22 = vrot.slane %v2058_v14, 2  ;;  %v2066_v60 = vrot.slane %v2065_v62, 2 }
 0x168   : > { %v2073_v25 = vrot.slane %v2072_v59, 2  ;;  %v2025_v32 = vadd.f32 %v2024_v2, %v2023_v47  ;;  %v3869_v3 = vadd.f32 %v2031_v6, %v2030_v36  ;;  %v3871_v53 = vadd.f32 %v2038_v5, %v2037_v45  ;;  %v2279_v36 = vld [vmem:[%s4364_s3 + $0x68] sm:$0xff]  ;;  %v2292_v6 = vld [vmem:[%s4364_s3 + $0xd0] sm:$0xff] }
 0x169   : > { %v3873_v19 = vadd.f32 %v2045_v20, %v2044_v15  ;;  %v3878_v26 = vadd.f32 %v2052_v46, %v2051_v42  ;;  %v3880_v35 = vadd.f32 %v2059_v22, %v2058_v14  ;;  %v3882_v63 = vadd.f32 %v2066_v60, %v2065_v62  ;;  %2453 = vmatpush3.msra.mxu0 %v2279_v36  ;;  %v2277_v42 = vld [vmem:[%s4364_s3 + $0x58] sm:$0xff]  ;;  %v2275_v22 = vld [vmem:[%s4364_s3 + $0x48] sm:$0xff] }
 0x16a   : > { %v3884_v57 = vadd.f32 %v2073_v25, %v2072_v59  ;;  %v2014_v15 = vmul.f32 %v3733_v28, %v4505_v9  ;;  %v2015_v27 = vmul.f32 %v3740_v24, %v4503_v39  ;;  %v2016_v30 = vmul.f32 %v3747_v55, %v4505_v9  ;;  %v2278_v55 = vld [vmem:[%s4364_s3 + $0x60] sm:$0xff]  ;;  %2454 = vmatprep.subr.mxu0 %v2294_v44 }
 0x16b   : > { %v2026_v10 = vrot.slane %v2025_v32, 1  ;;  %v2017_v11 = vmul.f32 %v3749_v61, %v4503_v39  ;;  %v2018_v12 = vmul.f32 %v3753_v34, %v4505_v9  ;;  %v2019_v28 = vmul.f32 %v3755_v41, %v4503_v39  ;;  %v2293_v34 = vld [vmem:[%s4364_s3 + $0xd8] sm:$0xff]  ;;  %2455 = vmatpush3.msra.mxu0 %v2278_v55 }
 0x16c   : > { %v2020_v24 = vmul.f32 %v3759_v0, %v4505_v9  ;;  %v2033_v52 = vrot.slane %v3869_v3, 1  ;;  %v2040_v47 = vrot.slane %v3871_v53, 1  ;;  %v2047_v61 = vrot.slane %v3873_v19, 1  ;;  %2456 = vmatprep.subr.mxu0 %v2293_v34 }
 0x16d   : > { %v2054_v45 = vrot.slane %v3878_v26, 1  ;;  %v3916_v41 = vadd.f32 %v2026_v10, %v2025_v32  ;;  %v2061_v0 = vrot.slane %v3880_v35, 1  ;;  %v2068_v39 = vrot.slane %v3882_v63, 1  ;;  %2457 = vmatpush3.msra.mxu0 %v2277_v42  ;;  %v2290_v32 = vld [vmem:[%s4364_s3 + $0xc0] sm:$0xff] }
 0x16e   : > { %v2075_v9 = vrot.slane %v3884_v57, 1  ;;  %v2077_v14 = vadd.f32 %v3825_v7, %v3821_v21  ;;  %v2084_v62 = vadd.f32 %v3833_v18, %v3829_v16  ;;  %v2091_v59 = vadd.f32 %v3841_v8, %v3837_v29  ;;  %v2276_v21 = vld [vmem:[%s4364_s3 + $0x50] sm:$0xff]  ;;  %v2291_v8 = vld [vmem:[%s4364_s3 + $0xc8] sm:$0xff]  ;;  %2458 = vmatprep.subr.mxu0 %v2292_v6 }
 0x16f   : > { %v2098_v2 = vadd.f32 %v3851_v23, %v3847_v48  ;;  %v2105_v5 = vadd.f32 %v2014_v15, %v3855_v54  ;;  %v2112_v20 = vadd.f32 %v2016_v30, %v2015_v27  ;;  %v2119_v43 = vadd.f32 %v2018_v12, %v2017_v11  ;;  %2459 = vmatpush3.msra.mxu0 %v2276_v21  ;;  %v2274_v30 = vld [vmem:[%s4364_s3 + $0x40] sm:$0xff] }
 0x170   : > { %v2126_v31 = vadd.f32 %v2020_v24, %v2019_v28  ;;  %v2078_v7 = vrot.slane %v2077_v14, 4  ;;  %v2085_v16 = vrot.slane %v2084_v62, 4  ;;  %v2092_v18 = vrot.slane %v2091_v59, 4  ;;  %2460 = vmatprep.subr.mxu0 %v2291_v8  ;;  %v2289_v28 = vld [vmem:[%s4364_s3 + $0xb8] sm:$0xff] }
 0x171   : > { %v2099_v29 = vrot.slane %v2098_v2, 4  ;;  %v2106_v48 = vrot.slane %v2105_v5, 4  ;;  %v2113_v23 = vrot.slane %v2112_v20, 4  ;;  %v2120_v54 = vrot.slane %v2119_v43, 4  ;;  %2461 = vmatpush3.msra.mxu0 %v2275_v22 }
 0x172   : > { %v2127_v46 = vrot.slane %v2126_v31, 4  ;;  %v2079_v60 = vadd.f32 %v2078_v7, %v2077_v14  ;;  %v2086_v25 = vadd.f32 %v2085_v16, %v2084_v62  ;;  %v2093_v13 = vadd.f32 %v2092_v18, %v2091_v59  ;;  %2462 = vmatprep.subr.mxu0 %v2290_v32  ;;  %v2273_v14 = vld [vmem:[%s4364_s3 + $0x38] sm:$0xff]  ;;  %v2272_v7 = vld [vmem:[%s4364_s3 + $0x30] sm:$0xff] }
 0x173   : > { %v2100_v1 = vadd.f32 %v2099_v29, %v2098_v2  ;;  %v2107_v33 = vadd.f32 %v2106_v48, %v2105_v5  ;;  %v2114_v36 = vadd.f32 %v2113_v23, %v2112_v20  ;;  %v2121_v15 = vadd.f32 %v2120_v54, %v2119_v43  ;;  %2463 = vmatpush3.msra.mxu0 %v2274_v30  ;;  %v2288_v5 = vld [vmem:[%s4364_s3 + $0xb0] sm:$0xff]  ;;  %v2287_v48 = vld [vmem:[%s4364_s3 + $0xa8] sm:$0xff] }
 0x174   : > { %v2128_v27 = vadd.f32 %v2127_v46, %v2126_v31  ;;  %v2080_v10 = vrot.slane %v2079_v60, 2  ;;  %v2087_v44 = vrot.slane %v2086_v25, 2  ;;  %v2094_v11 = vrot.slane %v2093_v13, 2  ;;  %2464 = vmatprep.subr.mxu0 %v2289_v28  ;;  %v4513_v30 = vld [vmem:[#allocation23_spill] sm:$0xff] }
 0x175   : > { %v2101_v12 = vrot.slane %v2100_v1, 2  ;;  %v2108_v24 = vrot.slane %v2107_v33, 2  ;;  %v2115_v55 = vrot.slane %v2114_v36, 2  ;;  %v2122_v34 = vrot.slane %v2121_v15, 2  ;;  %2465 = vmatpush3.msra.mxu0 %v2273_v14 }
 0x176   : > { %v2129_v42 = vrot.slane %v2128_v27, 2  ;;  %v2081_v62 = vadd.f32 %v2080_v10, %v2079_v60  ;;  %v2088_v59 = vadd.f32 %v2087_v44, %v2086_v25  ;;  %v2095_v2 = vadd.f32 %v2094_v11, %v2093_v13  ;;  %2466 = vmatprep.subr.mxu0 %v2288_v5  ;;  %v2271_v60 = vld [vmem:[%s4364_s3 + $0x28] sm:$0xff]  ;;  %v2284_v44 = vld [vmem:[%s4364_s3 + $0x90] sm:$0xff]  ;;  %v4514_v11 = vld [vmem:[#allocation24_spill] sm:$0xff] }
 0x177   : > { %v2102_v6 = vadd.f32 %v2101_v12, %v2100_v1  ;;  %v2109_v20 = vadd.f32 %v2108_v24, %v2107_v33  ;;  %v2116_v43 = vadd.f32 %v2115_v55, %v2114_v36  ;;  %v2123_v31 = vadd.f32 %v2122_v34, %v2121_v15  ;;  %2467 = vmatpush3.msra.mxu0 %v2272_v7  ;;  %v2286_v1 = vld [vmem:[%s4364_s3 + $0xa0] sm:$0xff]  ;;  %v4036_v36 = vpop.permute.xlu0 %347  ;;  %v4044_v15 = vld [vmem:[%s4363_s2 + $0x18] sm:$0xff]  ;;  %v2268_v55 = vld [vmem:[%s4364_s3 + $0x10] sm:$0xff] }
 0x178   : > { %v2130_v21 = vadd.f32 %v2129_v42, %v2128_v27  ;;  %v2082_v16 = vrot.slane %v2081_v62, 1  ;;  %v2089_v18 = vrot.slane %v2088_v59, 1  ;;  %v2096_v29 = vrot.slane %v2095_v2, 1  ;;  %2468 = vmatprep.subr.mxu0 %v2287_v48  ;;  %v4515_v34 = vld [vmem:[#allocation36_spill] sm:$0xff]  ;;  %v2283_v5 = vld [vmem:[%s4364_s3 + $0x88] sm:$0xff] }
 0x179   : > { %v2103_v8 = vrot.slane %v2102_v6, 1  ;;  %v3969_v23 = vadd.f32 %v2033_v52, %v3869_v3  ;;  %v2110_v54 = vrot.slane %v2109_v20, 1  ;;  %v2117_v46 = vrot.slane %v2116_v43, 1  ;;  %2469 = vmatpush3.msra.mxu0 %v2271_v60  ;;  %v4521_v7 = vld [vmem:[#allocation20_spill] sm:$0xff] }
 0x17a   : > { %v2124_v22 = vrot.slane %v2123_v31, 1  ;;  %v3977_v25 = vadd.f32 %v2040_v47, %v3871_v53  ;;  %v3982_v13 = vadd.f32 %v2047_v61, %v3873_v19  ;;  %v3987_v3 = vadd.f32 %v2054_v45, %v3878_v26  ;;  %v3995_v53 = vld [vmem:[%s4363_s2 + $0x10] sm:$0xff]  ;;  %v2270_v45 = vld [vmem:[%s4364_s3 + $0x20] sm:$0xff]  ;;  %2470 = vmatprep.subr.mxu0 %v2286_v1 }
 0x17b   : > { %v2131_v52 = vrot.slane %v2130_v21, 1  ;;  %v4000_v19 = vadd.f32 %v2061_v0, %v3880_v35  ;;  %v4005_v26 = vadd.f32 %v2068_v39, %v3882_v63  ;;  %v4010_v47 = vadd.f32 %v2075_v9, %v3884_v57  ;;  %v4024_v63 = vpop.permute.xlu1 %428  ;;  %v2285_v57 = vld [vmem:[%s4364_s3 + $0x98] sm:$0xff]  ;;  %2471 = vmatpush3.msra.mxu0 %v2270_v45  ;;  %v2282_v1 = vld [vmem:[%s4364_s3 + $0x80] sm:$0xff] }
 0x17c   : > { %v4012_v61 = vadd.f32 %v2082_v16, %v2081_v62  ;;  %v4017_v32 = vadd.f32 %v2089_v18, %v2088_v59  ;;  %v4019_v35 = vadd.f32 %v2096_v29, %v2095_v2  ;;  %v4021_v0 = vadd.f32 %v2103_v8, %v2102_v6  ;;  %2472 = vmatprep.subr.mxu0 %v2285_v57  ;;  %v4516_v62 = vld [vmem:[#allocation8_spill] sm:$0xff]  ;;  %v4517_v59 = vld [vmem:[#allocation11_spill] sm:$0xff]  ;;  %v2267_v18 = vld [vmem:[%s4364_s3 + $0x8] sm:$0xff] }
 0x17d   : > { %2648 = vrcp.f32 %v3634_v56  ;;  %v4029_v39 = vadd.f32 %v2110_v54, %v2109_v20  ;;  %v4031_v9 = vadd.f32 %v2117_v46, %v2116_v43  ;;  %v4033_v33 = vadd.f32 %v2124_v22, %v2123_v31  ;;  %v2269_v56 = vld [vmem:[%s4364_s3 + $0x18] sm:$0xff]  ;;  %v4519_v20 = vld [vmem:[#allocation37_spill] sm:$0xff]  ;;  %v4522_v29 = vld [vmem:[#allocation14_spill] sm:$0xff] }
 0x17e   : > { %2650 = vrcp.f32 %v3664_v40  ;;  %v4046_v27 = vadd.f32 %v2131_v52, %v2130_v21  ;;  %v2167_v10 = vrot.slane %v3995_v53, 1  ;;  %v2168_v40 = vrot.slane %v3995_v53, 2  ;;  %2473 = vmatpush3.msra.mxu0 %v2269_v56  ;;  %v4520_v31 = vld [vmem:[#allocation17_spill] sm:$0xff]  ;;  %v4524_v54 = vld [vmem:[#allocation12_spill] sm:$0xff]  ;;  %v4525_v22 = vld [vmem:[#allocation26_spill] sm:$0xff] }
 0x17f   : > { %2652 = vrcp.f32 %v4513_v30  ;;  %v2169_v12 = vrot.slane %v3995_v53, 3  ;;  %v2170_v28 = vrot.slane %v3995_v53, 4  ;;  %v2171_v24 = vrot.slane %v3995_v53, 5  ;;  %2474 = vmatprep.subr.mxu0 %v2284_v44  ;;  %v4523_v8 = vld [vmem:[#allocation5_spill] sm:$0xff]  ;;  %v4089_v52 = vpop.permute.xlu1 %351  ;;  %v4100_v30 = vpop.permute.xlu0 %435 }
 0x180   : > { %2654 = vrcp.f32 %v4514_v11  ;;  %v2172_v42 = vrot.slane %v3995_v53, 6  ;;  %v2173_v14 = vrot.slane %v3995_v53, 7  ;;  %v4518_v2 = vcombine.high %v4517_v59, %v4517_v59  ;;  %2475 = vmatpush3.msra.mxu0 %v2268_v55  ;;  %v2266_v44 = vld [vmem:[%s4364_s3] sm:$0xff] }
 0x181   : > { %2656 = vrcp.f32 %v4515_v34  ;;  %v2174_v43 = vrot.slane %v4044_v15, 1  ;;  %v713_v21 = vcombine.high %v4520_v31, %v4520_v31  ;;  %v688_v16 = vmul.f32 %v4521_v7, %v4024_v63  ;;  %2476 = vmatprep.subr.mxu0 %v2283_v5  ;;  %v4526_v59 = vld [vmem:[#allocation33_spill] sm:$0xff]  ;;  %v4527_v31 = vld [vmem:[#allocation15_spill] sm:$0xff] }
 0x182   : > { %v4068_v6 = vrot.slane %v4518_v2, %v4516_v62  ;;  %2658 = vrcp.f32 %v4519_v20  ;;  %v550_v46 = vcombine.high %v4524_v54, %v4524_v54  ;;  %v762_v60 = vcombine.high %v4525_v22, %v4525_v22  ;;  %2477 = vmatpush3.msra.mxu0 %v2267_v18 }
 0x183   : > { %2660 = vrcp.f32 %v4522_v29  ;;  %v2175_v45 = vrot.slane %v4044_v15, 2  ;;  %v2176_v57 = vrot.slane %v4044_v15, 3  ;;  %v4098_v56 = vrot.slane %v713_v21, %v4516_v62  ;;  %2478 = vmatprep.subr.mxu0 %v2282_v1  ;;  %v4133_v22 = vpop.permute.xlu0 %358 }
 0x184   : > { %v606_v48 = vrot.slane %v4068_v6, %v4523_v8  ;;  %2662 = vrcp.f32 %v3773_v51  ;;  %v2177_v11 = vrot.slane %v4044_v15, 4  ;;  %v4109_v55 = vrot.slane %v550_v46, %v4516_v62  ;;  %2479 = vmatpush3.msra.mxu0 %v2266_v44 }
 0x185   : > { %2664 = vrcp.f32 %v3775_v58  ;;  %v818_v34 = vrot.slane %v4098_v56, %v4523_v8  ;;  %v900_v2 = vsub.f32 %v688_v16, %v4526_v59  ;;  %v4120_v20 = vrot.slane %v762_v60, %v4516_v62  ;;  %v4528_v16 = vld [vmem:[#allocation28_spill] sm:$0xff]  ;;  %v4529_v59 = vld [vmem:[#allocation27_spill] sm:$0xff] }
 0x186   : > { %v673_v51 = vmul.f32 %v606_v48, %v4036_v36  ;;  %2666 = vrcp.f32 %v3777_v17  ;;  %v674_v5 = vmul.f32 %v606_v48, %v4089_v52  ;;  %v638_v58 = vrot.slane %v4109_v55, %v4523_v8 }
 0x187   : > { %2668 = vrcp.f32 %v3781_v49  ;;  %v531_v21 = vcombine.high %v4527_v31, %v4527_v31  ;;  %v743_v18 = vcombine.high %v4528_v16, %v4528_v16  ;;  %v2178_v49 = vrot.slane %v4044_v15, 5 }
 0x188   : > { %2670 = vrcp.f32 %v3783_v38  ;;  %v885_v17 = vsub.f32 %v673_v51, %v818_v34  ;;  %v886_v7 = vsub.f32 %v674_v5, %v818_v34  ;;  %v2179_v29 = vrot.slane %v4044_v15, 6 }
 0x189   : > { %2672 = vrcp.f32 %v3789_v37  ;;  %v689_v62 = vmul.f32 %v638_v58, %v4100_v30  ;;  %v2180_v54 = vrot.slane %v4044_v15, 7  ;;  %v957_v46 = vmul.f32 1.442695, %v900_v2 }
 0x18a   : > { %v2649_v48 = vpop.eup %2648  ;;  %2674 = vrcp.f32 %v3801_v50  ;;  %v927_v38 = vmul.f32 1.442695, %v885_v17  ;;  %v4139_v1 = vrot.slane %v4120_v20, %v4523_v8  ;;  %v4142_v44 = vrot.slane %v531_v21, %v4523_v8  ;;  %v4144_v50 = vpop.permute.xlu1 %439 }
 0x18b   : > { %v2651_v60 = vpop.eup %2650  ;;  %v2134_v37 = vmul.f32 %v2649_v48, %v3916_v41  ;;  %2676 = vrcp.f32 %v3815_v4  ;;  %v929_v2 = vmul.f32 1.442695, %v886_v7  ;;  %v4149_v41 = vrot.slane %v743_v18, %v4523_v8 }
 0x18c   : > { %v2653_v51 = vpop.eup %2652  ;;  %v2136_v34 = vmul.f32 %v2651_v60, %v3969_v23  ;;  %2678 = vrcp.f32 %v4529_v59  ;;  %v901_v31 = vsub.f32 %v689_v62, %v4139_v1  ;;  %v4155_v21 = vmul.f32 %v4142_v44, %v4133_v22 }
 0x18d   : > { %v2655_v4 = vpop.eup %2654  ;;  %v2138_v5 = vmul.f32 %v2653_v51, %v3977_v25  ;;  %2680 = vpow2.f32 %v927_v38  ;;  %v4161_v16 = vmul.f32 %v638_v58, %v4144_v50  ;;  %v2197_v62 = vmul.f32 %v2134_v37, %v3995_v53  ;;  %v4530_v38 = vld [vmem:[#allocation16_spill] sm:$0xff] }
 0x18e   : > { %v2657_v17 = vpop.eup %2656  ;;  %v2140_v23 = vmul.f32 %v2655_v4, %v3982_v13  ;;  %v2198_v7 = vmul.f32 %v2167_v10, %v2136_v34  ;;  %2682 = vpow2.f32 %v957_v46  ;;  %v580_v60 = vcombine.high %v4530_v38, %v4530_v38 }
 0x18f   : > { %v2659_v18 = vpop.eup %2658  ;;  %v2142_v25 = vmul.f32 %v2657_v17, %v3987_v3  ;;  %v2199_v48 = vmul.f32 %v2168_v40, %v2138_v5  ;;  %2684 = vpow2.f32 %v929_v2  ;;  %v959_v59 = vmul.f32 1.442695, %v901_v31 }
 0x190   : > { %v2661_v51 = vpop.eup %2660  ;;  %v2144_v13 = vmul.f32 %v2659_v18, %v4000_v19  ;;  %v2200_v10 = vmul.f32 %v2169_v12, %v2140_v23  ;;  %v2229_v46 = vrot.slane %v2198_v7, 7  ;;  %v902_v53 = vsub.f32 %v4161_v16, %v4139_v1 }
 0x191   : > { %v2663_v58 = vpop.eup %2662  ;;  %v2146_v34 = vmul.f32 %v2661_v51, %v4005_v26  ;;  %v2201_v3 = vmul.f32 %v2170_v28, %v2142_v25  ;;  %v2231_v37 = vrot.slane %v2199_v48, 6  ;;  %2686 = vpow2.f32 %v959_v59 }
 0x192   : > { %v2665_v40 = vpop.eup %2664  ;;  %v2148_v4 = vmul.f32 %v2663_v58, %v4010_v47  ;;  %v2202_v5 = vmul.f32 %v2171_v24, %v2144_v13  ;;  %v2230_v19 = vsel %vm1324_vm11, %v2229_v46, %v2197_v62  ;;  %v2233_v17 = vrot.slane %v2200_v10, 5 }
 0x193   : > { %v2667_v12 = vpop.eup %2666  ;;  %v2150_v2 = vmul.f32 %v2665_v40, %v4012_v61  ;;  %v2203_v26 = vmul.f32 %v2172_v42, %v2146_v34  ;;  %v2232_v23 = vsel %vm1327_vm12, %v2231_v37, %v2230_v19  ;;  %v2235_v28 = vrot.slane %v2201_v3, 4 }
 0x194   : > { %v2669_v7 = vpop.eup %2668  ;;  %v2152_v31 = vmul.f32 %v2667_v12, %v4017_v32  ;;  %v2204_v47 = vmul.f32 %v2173_v14, %v2148_v4  ;;  %v2234_v24 = vsel %vm1330_vm13, %v2233_v17, %v2232_v23  ;;  %v2237_v18 = vrot.slane %v2202_v5, 3  ;;  %v4531_v23 = vld [vmem:[#allocation22_spill] sm:$0xff] }
 0x195   : > { %v2671_v25 = vpop.eup %2670  ;;  %v2154_v62 = vmul.f32 %v2669_v7, %v4019_v35  ;;  %v2236_v61 = vsel %vm1333_vm14, %v2235_v28, %v2234_v24  ;;  %v2239_v48 = vrot.slane %v2203_v26, 2  ;;  %v2205_v3 = vmul.f32 %v2150_v2, %v4044_v15  ;;  %v4221_v24 = vpop.permute.xlu1 %362 }
 0x196   : > { %v2673_v42 = vpop.eup %2672  ;;  %v2156_v51 = vmul.f32 %v2671_v25, %v4021_v0  ;;  %v2206_v13 = vmul.f32 %v2174_v43, %v2152_v31  ;;  %v2238_v32 = vsel %vm1336_vm15, %v2237_v18, %v2236_v61  ;;  %v2241_v58 = vrot.slane %v2204_v47, 1  ;;  %v4532_v61 = vld [vmem:[#allocation10_spill] sm:$0xff] }
 0x197   : > { %v2675_v14 = vpop.eup %2674  ;;  %v2158_v10 = vmul.f32 %v2673_v42, %v4029_v39  ;;  %v2207_v35 = vmul.f32 %v2175_v45, %v2154_v62  ;;  %v2240_v46 = vsel %vm1339_vm0, %v2239_v48, %v2238_v32 }
 0x198   : > { %v2677_v34 = vpop.eup %2676  ;;  %v2160_v0 = vmul.f32 %v2675_v14, %v4031_v9  ;;  %v2208_v43 = vmul.f32 %v2176_v57, %v2156_v51  ;;  %v2243_v37 = vrot.slane %v2206_v13, 7  ;;  %v2242_v45 = vsel %vm1342_vm1, %v2241_v58, %v2240_v46  ;;  %v4533_v51 = vld [vmem:[#allocation35_spill] sm:$0xff] }
 0x199   : > { %v2679_v59 = vpop.eup %2678  ;;  %v2162_v1 = vmul.f32 %v2677_v34, %v4033_v33  ;;  %v2209_v39 = vmul.f32 %v2177_v11, %v2158_v10  ;;  %v2245_v16 = vrot.slane %v2207_v35, 6  ;;  %v961_v11 = vmul.f32 1.442695, %v902_v53  ;;  %v4231_v35 = vpop.permute.xlu0 %446  ;;  %v4534_v58 = vld [vmem:[#allocation7_spill] sm:$0xff]  ;;  %v4535_v34 = vld [vmem:[#allocation9_spill] sm:$0xff] }
 0x19a   : > { %v2681_v40 = vpop.eup %2680  ;;  %v2164_v4 = vmul.f32 %v2679_v59, %v4046_v27  ;;  %v2210_v9 = vmul.f32 %v2178_v49, %v2160_v0  ;;  %v2244_v5 = vsel %vm1324_vm11, %v2243_v37, %v2205_v3  ;;  %v2247_v19 = vrot.slane %v2208_v43, 5 }
 0x19b   : > { %v2683_v57 = vpop.eup %2682  ;;  %v2211_v17 = vmul.f32 %v2179_v29, %v2162_v1  ;;  %v2246_v33 = vsel %vm1327_vm12, %v2245_v16, %v2244_v5  ;;  %v2249_v12 = vrot.slane %v2209_v39, 4  ;;  %v1093_v47 = vmul.f32 %v2681_v40, %v4036_v36  ;;  %v4244_v16 = vpop.permute.xlu1 %450 }
 0x19c   : > { %v2212_v2 = vmul.f32 %v2180_v54, %v2164_v4  ;;  %v2248_v26 = vsel %vm1330_vm13, %v2247_v19, %v2246_v33  ;;  %v2251_v27 = vrot.slane %v2210_v9, 3  ;;  %v1055_v28 = vadd.f32 %v2683_v57, %v4531_v23  ;;  %v2685_v49 = vpop.eup %2684  ;;  %v4538_v19 = vld [vmem:[#allocation21_spill] sm:$0xff] }
 0x19d   : > { %v2250_v7 = vsel %vm1333_vm14, %v2249_v12, %v2248_v26  ;;  %v2253_v31 = vrot.slane %v2211_v17, 2  ;;  %v1108_v29 = vmul.f32 %v2683_v57, %v4024_v63  ;;  %v1006_v54 = vadd.f32 %v2685_v49, %v2681_v40  ;;  %v4539_v33 = vld [vmem:[#allocation25_spill] sm:$0xff] }
 0x19e   : > { %v2252_v18 = vsel %vm1336_vm15, %v2251_v27, %v2250_v7  ;;  %v2255_v25 = vrot.slane %v2212_v2, 1  ;;  %v1056_v15 = vrot.slane %v1055_v28, 4  ;;  %v1094_v42 = vmul.f32 %v2685_v49, %v4089_v52  ;;  %v2687_v46 = vpop.eup %2686 }
 0x19f   : > { %v2254_v62 = vsel %vm1339_vm0, %v2253_v31, %v2252_v18  ;;  %v1199_v48 = vadd.f32 %v1108_v29, %v4532_v61  ;;  %2688 = vpow2.f32 %v961_v11  ;;  %v1007_v63 = vrot.slane %v1006_v54, 4 }
 0x1a0   : > { %2690 = vrcp.f32 %v4533_v51  ;;  %v2256_v36 = vsel %vm1342_vm1, %v2255_v25, %v2254_v62  ;;  %v1057_v13 = vadd.f32 %v1056_v15, %v1055_v28  ;;  %v1150_v14 = vadd.f32 %v1094_v42, %v1093_v47 }
 0x1a1   : > { %v2259_v32 = vadd.f32 %v2256_v36, %v2242_v45  ;;  %v1200_v53 = vrot.slane %v1199_v48, 4  ;;  %v887_v10 = vsub.f32 %v4155_v21, %v4149_v41  ;;  %v4536_v0 = vrot.slane %v4535_v34, 4  ;;  %v4537_v45 = vld [vmem:[#allocation30_spill] sm:$0xff] }
 0x1a2   : > { %v1058_v3 = vrot.slane %v1057_v13, 2  ;;  %v1008_v43 = vadd.f32 %v1007_v63, %v1006_v54  ;;  %v642_v37 = vrot.slane %v580_v60, %v4523_v8  ;;  %v1151_v39 = vrot.slane %v1150_v14, 4 }
 0x1a3   : > { %v4236_v52 = vmul.f32 %v4536_v0, %v4534_v58  ;;  %v2260_v59 = vrot.slane %v2259_v32, 4  ;;  %v1201_v1 = vadd.f32 %v1200_v53, %v1199_v48  ;;  %v792_v21 = vcombine.high %v4537_v45, %v4537_v45 }
 0x1a4   : > { %v1059_v40 = vadd.f32 %v1058_v3, %v1057_v13  ;;  %v1009_v4 = vrot.slane %v1008_v43, 2  ;;  %v676_v9 = vmul.f32 %v4142_v44, %v4221_v24  ;;  %v533_v5 = vcombine.high %v4068_v6, %v4068_v6  ;;  %v4257_v6 = vpop.permute.xlu0 %369 }
 0x1a5   : > { %v1270_v57 = vrot.slane %v4538_v19, 3  ;;  %v2261_v38 = vadd.f32 %v2260_v59, %v2259_v32  ;;  %v931_v60 = vmul.f32 1.442695, %v887_v10  ;;  %v691_v17 = vmul.f32 %v642_v37, %v4231_v35  ;;  %v4296_v19 = vld [vmem:[%s4363_s2] sm:$0xff] }
 0x1a6   : > { %v4540_v12 = vrot.slane %v4539_v33, 1  ;;  %v1060_v2 = vrot.slane %v1059_v40, 1  ;;  %v1010_v26 = vadd.f32 %v1009_v4, %v1008_v43  ;;  %v888_v27 = vsub.f32 %v676_v9, %v4149_v41  ;;  %v4263_v41 = vpop.permute.xlu1 %373 }
 0x1a7   : > { %v2262_v23 = vrot.slane %v2261_v38, 2  ;;  %v1202_v28 = vrot.slane %v1201_v1, 2  ;;  %v1152_v44 = vadd.f32 %v1151_v39, %v1150_v14  ;;  %v854_v49 = vrot.slane %v792_v21, %v4523_v8 }
 0x1a8   : > { %v1198_v11 = vadd.f32 %v4540_v12, %v4539_v33  ;;  %v1332_v7 = vrot.slane %v4236_v52, 4  ;;  %v1061_v31 = vadd.f32 %v1060_v2, %v1059_v40  ;;  %v1011_v47 = vrot.slane %v1010_v26, 1  ;;  %v4272_v0 = vpop.permute.xlu0 %457 }
 0x1a9   : > { %v614_v29 = vrot.slane %v533_v5, %v4523_v8  ;;  %v2263_v18 = vadd.f32 %v2262_v23, %v2261_v38  ;;  %2692 = vpow2.f32 %v931_v60  ;;  %v903_v25 = vsub.f32 %v691_v17, %v854_v49  ;;  %v4541_v60 = vld [vmem:[#allocation19_spill] sm:$0xff] }
 0x1aa   : > { %v745_v15 = vcombine.high %v4098_v56, %v4098_v56  ;;  %2694 = vrcp.f32 %v1061_v31  ;;  %v1012_v54 = vadd.f32 %v1011_v47, %v1010_v26  ;;  %v933_v62 = vmul.f32 1.442695, %v888_v27 }
 0x1ab   : > { %v677_v61 = vmul.f32 %v614_v29, %v4257_v6  ;;  %v2264_v48 = vrot.slane %v2263_v18, 1  ;;  %v1203_v42 = vadd.f32 %v1202_v28, %v1201_v1  ;;  %v1109_v51 = vmul.f32 %v2687_v46, %v4100_v30  ;;  %v4277_v1 = vpop.permute.xlu1 %461 }
 0x1ac   : > { %v1153_v36 = vrot.slane %v1152_v44, 2  ;;  %v2689_v13 = vpop.eup %2688  ;;  %2696 = vrcp.f32 %v1012_v54  ;;  %v826_v63 = vrot.slane %v745_v15, %v4523_v8  ;;  %v692_v32 = vmul.f32 %v642_v37, %v4244_v16 }
 0x1ad   : > { %v582_v56 = vcombine.high %v4109_v55, %v4109_v55  ;;  %v2691_v53 = vpop.eup %2690  ;;  %v2265_v14 = vadd.f32 %v2264_v48, %v2263_v18  ;;  %v1062_v10 = vadd.f32 %v2689_v13, %v2687_v46  ;;  %v1110_v58 = vmul.f32 %v2689_v13, %v4144_v50 }
 0x1ae   : > { %v963_v34 = vmul.f32 1.442695, %v903_v25  ;;  %2698 = vpow2.f32 %v933_v62  ;;  %v889_v30 = vsub.f32 %v677_v61, %v826_v63  ;;  %v904_v52 = vsub.f32 %v692_v32, %v854_v49 }
 0x1af   : > { %v646_v3 = vrot.slane %v582_v56, %v4523_v8  ;;  %2362 = vmatprep.mubr.f32.mxu0 %v2265_v14  ;;  %v1154_v43 = vadd.f32 %v1153_v36, %v1152_v44  ;;  %v1063_v59 = vrot.slane %v1062_v10, 4  ;;  %v1206_v37 = vadd.f32 %v1110_v58, %v1109_v51  ;;  %v4290_v44 = vld [vmem:[%s4363_s2 + $0x8] sm:$0xff] }
 0x1b0   : > { %v794_v55 = vcombine.high %v4120_v20, %v4120_v20  ;;  %v935_v46 = vmul.f32 1.442695, %v889_v30  ;;  %v965_v39 = vmul.f32 1.442695, %v904_v52  ;;  %v678_v45 = vmul.f32 %v614_v29, %v4263_v41  ;;  %v4542_v56 = vld [vmem:[#allocation34_spill] sm:$0xff] }
 0x1b1   : > { %v693_v50 = vmul.f32 %v646_v3, %v4272_v0  ;;  %v1250_v21 = vmul.f32 %v2691_v53, %v1198_v11  ;;  %v1064_v40 = vadd.f32 %v1063_v59, %v1062_v10  ;;  %2700 = vpow2.f32 %v963_v34 }
 0x1b2   : > { %v858_v4 = vrot.slane %v794_v55, %v4523_v8  ;;  %v1204_v9 = vrot.slane %v1203_v42, 1  ;;  %v890_v5 = vsub.f32 %v678_v45, %v826_v63  ;;  %v694_v38 = vmul.f32 %v646_v3, %v4277_v1 }
 0x1b3   : > { %v1334_v20 = vsel %vm1333_vm14, %v1332_v7, %v4541_v60  ;;  %v1065_v17 = vrot.slane %v1064_v40, 2  ;;  %v1207_v33 = vrot.slane %v1206_v37, 4  ;;  %2702 = vpow2.f32 %v965_v39 }
 0x1b4   : > { %v905_v12 = vsub.f32 %v693_v50, %v858_v4  ;;  %v1155_v2 = vrot.slane %v1154_v43, 1  ;;  %2704 = vpow2.f32 %v935_v46  ;;  %v937_v26 = vmul.f32 1.442695, %v890_v5 }
 0x1b5   : > { %v906_v27 = vsub.f32 %v694_v38, %v858_v4  ;;  %v1302_v11 = vmul.f32 %v1270_v57, %v1250_v21  ;;  %v1066_v23 = vadd.f32 %v1065_v17, %v1064_v40  ;;  %v1271_v49 = vrot.slane %v4290_v44, 4 }
 0x1b6   : > { %v967_v8 = vmul.f32 1.442695, %v905_v12  ;;  %v2693_v28 = vpop.eup %2692  ;;  %v1205_v7 = vadd.f32 %v1204_v9, %v1203_v42  ;;  %2706 = vpow2.f32 %v937_v26  ;;  %v1208_v18 = vadd.f32 %v1207_v33, %v1206_v37 }
 0x1b7   : > { %v969_v31 = vmul.f32 1.442695, %v906_v27  ;;  %v2695_v47 = vpop.eup %2694  ;;  %v1067_v29 = vrot.slane %v1066_v23, 1  ;;  %v1265_v57 = vrot.slane %v4296_v19, 5  ;;  %v1156_v15 = vadd.f32 %v1155_v2, %v1154_v43 }
 0x1b8   : > { %v1252_v25 = vmul.f32 %v2695_v47, %v1205_v7  ;;  %v1348_v62 = vrot.slane %v1302_v11, 5  ;;  %v1209_v36 = vrot.slane %v1208_v18, 2  ;;  %v1095_v43 = vmul.f32 %v2693_v28, %v4133_v22 }
 0x1b9   : > { %2708 = vpow2.f32 %v969_v31  ;;  %v2697_v54 = vpop.eup %2696  ;;  %v1068_v61 = vadd.f32 %v1067_v29, %v1066_v23  ;;  %v1272_v17 = vrot.slane %v4290_v44, 5 }
 0x1ba   : > { %2710 = vpow2.f32 %v967_v8  ;;  %v1303_v48 = vmul.f32 %v1271_v49, %v1252_v25  ;;  %v1238_v42 = vmul.f32 %v2697_v54, %v1156_v15  ;;  %v1349_v53 = vsel %vm1330_vm13, %v1348_v62, %v4542_v56 }
 0x1bb   : > { %v2699_v51 = vpop.eup %2698  ;;  %2712 = vrcp.f32 %v1068_v61  ;;  %v1210_v52 = vadd.f32 %v1209_v36, %v1208_v18 }
 0x1bc   : > { %v1350_v13 = vrot.slane %v1303_v48, 4  ;;  %v1296_v63 = vmul.f32 %v1265_v57, %v1238_v42  ;;  %v1013_v32 = vadd.f32 %v2699_v51, %v2693_v28  ;;  %v1096_v34 = vmul.f32 %v2699_v51, %v4221_v24 }
 0x1bd   : > { %v1211_v24 = vrot.slane %v1210_v52, 1 }
 0x1be   : > { %v2701_v14 = vpop.eup %2700  ;;  %v1335_v10 = vrot.slane %v1296_v63, 3  ;;  %v1014_v58 = vrot.slane %v1013_v32, 4  ;;  %v1351_v30 = vsel %vm1333_vm14, %v1350_v13, %v1349_v53  ;;  %v1157_v21 = vadd.f32 %v1096_v34, %v1095_v43 }
 0x1bf   : > { %v1111_v46 = vmul.f32 %v2701_v14, %v4231_v35  ;;  %v1212_v27 = vadd.f32 %v1211_v24, %v1210_v52 }
 0x1c0   : > { %v2703_v3 = vpop.eup %2702  ;;  %v1015_v59 = vadd.f32 %v1014_v58, %v1013_v32  ;;  %v4305_v37 = vsel %vm1336_vm15, %v1335_v10, %v1334_v20  ;;  %v1158_v2 = vrot.slane %v1157_v21, 4 }
 0x1c1   : > { %v2705_v55 = vpop.eup %2704  ;;  %v1069_v39 = vadd.f32 %v2703_v3, %v2701_v14  ;;  %v1112_v50 = vmul.f32 %v2703_v3, %v4244_v16 }
 0x1c2   : > { %v1016_v45 = vrot.slane %v1015_v59, 2  ;;  %v1097_v38 = vmul.f32 %v2705_v55, %v4257_v6  ;;  %v1159_v29 = vadd.f32 %v1158_v2, %v1157_v21 }
 0x1c3   : > { %v2707_v40 = vpop.eup %2706  ;;  %v1070_v4 = vrot.slane %v1069_v39, 4  ;;  %v1213_v9 = vadd.f32 %v1112_v50, %v1111_v46 }
 0x1c4   : > { %v1017_v5 = vadd.f32 %v1016_v45, %v1015_v59  ;;  %v1020_v22 = vadd.f32 %v2707_v40, %v2705_v55  ;;  %v1098_v60 = vmul.f32 %v2707_v40, %v4263_v41  ;;  %v1160_v63 = vrot.slane %v1159_v29, 2 }
 0x1c5   : > { %v1071_v33 = vadd.f32 %v1070_v4, %v1069_v39  ;;  %v1214_v23 = vrot.slane %v1213_v9, 4 }
 0x1c6   : > { %v2709_v20 = vpop.eup %2708  ;;  %v1018_v12 = vrot.slane %v1017_v5, 1  ;;  %v1021_v16 = vrot.slane %v1020_v22, 4  ;;  %v1164_v26 = vadd.f32 %v1098_v60, %v1097_v38  ;;  %v1161_v52 = vadd.f32 %v1160_v63, %v1159_v29 }
 0x1c7   : > { %v2711_v35 = vpop.eup %2710  ;;  %v1072_v11 = vrot.slane %v1071_v33, 2  ;;  %v1114_v6 = vmul.f32 %v2709_v20, %v4277_v1  ;;  %v1215_v62 = vadd.f32 %v1214_v23, %v1213_v9  ;;  %v1273_v38 = vrot.slane %v4290_v44, 6 }
 0x1c8   : > { %v1076_v8 = vadd.f32 %v2711_v35, %v2709_v20  ;;  %v2713_v28 = vpop.eup %2712  ;;  %v1019_v49 = vadd.f32 %v1018_v12, %v1017_v5  ;;  %v1022_v7 = vadd.f32 %v1021_v16, %v1020_v22  ;;  %v1113_v18 = vmul.f32 %v2711_v35, %v4272_v0 }
 0x1c9   : > { %v1254_v31 = vmul.f32 %v2713_v28, %v1212_v27  ;;  %v1073_v41 = vadd.f32 %v1072_v11, %v1071_v33  ;;  %v1165_v57 = vrot.slane %v1164_v26, 4  ;;  %v1216_v53 = vrot.slane %v1215_v62, 2 }
 0x1ca   : > { %v1077_v47 = vrot.slane %v1076_v8, 4  ;;  %v1023_v25 = vrot.slane %v1022_v7, 2  ;;  %2714 = vrcp.f32 %v1019_v49  ;;  %v1220_v42 = vadd.f32 %v1114_v6, %v1113_v18 }
 0x1cb   : > { %v1304_v15 = vmul.f32 %v1272_v17, %v1254_v31  ;;  %v1074_v54 = vrot.slane %v1073_v41, 1  ;;  %v1166_v32 = vadd.f32 %v1165_v57, %v1164_v26  ;;  %v1217_v43 = vadd.f32 %v1216_v53, %v1215_v62 }
 0x1cc   : > { %v1078_v61 = vadd.f32 %v1077_v47, %v1076_v8  ;;  %v1024_v48 = vadd.f32 %v1023_v25, %v1022_v7  ;;  %v1221_v56 = vrot.slane %v1220_v42, 4  ;;  %v1162_v46 = vrot.slane %v1161_v52, 1 }
 0x1cd   : > { %v1352_v51 = vrot.slane %v1304_v15, 3  ;;  %v1075_v36 = vadd.f32 %v1074_v54, %v1073_v41  ;;  %v1167_v3 = vrot.slane %v1166_v32, 2  ;;  %v1218_v50 = vrot.slane %v1217_v43, 1 }
 0x1ce   : > { %v1079_v13 = vrot.slane %v1078_v61, 2  ;;  %v1025_v1 = vrot.slane %v1024_v48, 1  ;;  %v1222_v34 = vadd.f32 %v1221_v56, %v1220_v42  ;;  %v1163_v40 = vadd.f32 %v1162_v46, %v1161_v52 }
 0x1cf   : > { %2716 = vrcp.f32 %v1075_v36  ;;  %v1353_v0 = vsel %vm1336_vm15, %v1352_v51, %v1351_v30  ;;  %v1168_v39 = vadd.f32 %v1167_v3, %v1166_v32  ;;  %v1219_v4 = vadd.f32 %v1218_v50, %v1217_v43 }
 0x1d0   : > { %v1080_v14 = vadd.f32 %v1079_v13, %v1078_v61  ;;  %v1026_v10 = vadd.f32 %v1025_v1, %v1024_v48  ;;  %v1223_v55 = vrot.slane %v1222_v34, 2  ;;  %v1266_v30 = vrot.slane %v4296_v19, 6 }
 0x1d1   : > { %v1169_v24 = vrot.slane %v1168_v39, 1  ;;  %v1267_v20 = vrot.slane %v4296_v19, 7  ;;  %v1274_v16 = vrot.slane %v4290_v44, 7 }
 0x1d2   : > { %v1081_v58 = vrot.slane %v1080_v14, 1  ;;  %2718 = vrcp.f32 %v1026_v10  ;;  %v1224_v21 = vadd.f32 %v1223_v55, %v1222_v34 }
 0x1d3   : > { %v1170_v17 = vadd.f32 %v1169_v24, %v1168_v39 }
 0x1d4   : > { %v1082_v59 = vadd.f32 %v1081_v58, %v1080_v14  ;;  %v1225_v60 = vrot.slane %v1224_v21, 1 }
 0x1d6   : > { %2720 = vrcp.f32 %v1082_v59  ;;  %v1226_v26 = vadd.f32 %v1225_v60, %v1224_v21 }
 0x1d7   : > { %v2715_v45 = vpop.eup %2714 }
 0x1d8   : > { %v1240_v5 = vmul.f32 %v2715_v45, %v1163_v40 }
 0x1da   : > { %v1297_v35 = vmul.f32 %v1266_v30, %v1240_v5 }
 0x1dc   : > { %v2717_v9 = vpop.eup %2716  ;;  %v1338_v8 = vrot.slane %v1297_v35, 2 }
 0x1dd   : > { %v1256_v22 = vmul.f32 %v2717_v9, %v1219_v4 }
 0x1de   : > { %v1340_v19 = vsel %vm1339_vm0, %v1338_v8, %v4305_v37  ;;  %v274_v37 = vld [vmem:[%s4363_s2 + $0x22] sm:$0x1] }
 0x1df   : > { %v2719_v33 = vpop.eup %2718  ;;  %v1305_v12 = vmul.f32 %v1273_v38, %v1256_v22 }
 0x1e0   : > { %v1242_v2 = vmul.f32 %v2719_v33, %v1170_v17 }
 0x1e1   : > { %v1354_v28 = vrot.slane %v1305_v12, 2 }
 0x1e2   : > { %v1298_v11 = vmul.f32 %v1267_v20, %v1242_v2 }
 0x1e3   : > { %v2721_v27 = vpop.eup %2720  ;;  %v1355_v31 = vsel %vm1339_vm0, %v1354_v28, %v1353_v0 }
 0x1e4   : > { %v1258_v23 = vmul.f32 %v2721_v27, %v1226_v26  ;;  %v1341_v49 = vrot.slane %v1298_v11, 1 }
 0x1e6   : > { %v1306_v7 = vmul.f32 %v1274_v16, %v1258_v23  ;;  %v1343_v41 = vsel %vm1342_vm1, %v1341_v49, %v1340_v19 }
 0x1e8   : > { %v1356_v6 = vrot.slane %v1306_v7, 1 }
 0x1ea   : > { %v1357_v44 = vsel %vm1342_vm1, %v1356_v6, %v1355_v31 }
 0x1eb   : > { %v1360_v47 = vadd.f32 %v1357_v44, %v1343_v41 }
 0x1ed   : > { %v1361_v29 = vrot.slane %v1360_v47, 4 }
 0x1ef   : > { %v1362_v18 = vadd.f32 %v1361_v29, %v1360_v47 }
 0x1f1   : > { %v1363_v25 = vrot.slane %v1362_v18, 2 }
 0x1f3   : > { %v1364_v57 = vadd.f32 %v1363_v25, %v1362_v18 }
 0x1f5   : > { %v1365_v15 = vrot.slane %v1364_v57, 1 }
 0x1f7   : > { %v1366_v54 = vadd.f32 %v1365_v15, %v1364_v57 }
 0x1f9   : > { %2363 = vmatmul.mubr.f32.vlgmr.msra.gmra.mxu0 %v1366_v54 }
 0x2b9   : > { %v2480_v62 = vpop.f32.mrf.mxu0 }
 0x2bb   : > { %v2481_v61 = vpop.f32.mrf.mxu0 }
 0x2bc   : > { %v2482_v48 = vadd.f32 %v2481_v61, %v2480_v62 }
 0x2be   : > { %v2365_v42 = vadd.f32 %v2482_v48, %v274_v37 }
 0x2c0   : > { %2368 = vst [vmem:[%s190_s29] sm:$0x1] %v2365_v42 }
 0x2c1   : > { %2739 = shalt.err (!%p2736_p3)
}
 0x2c2   : > { %s2740_s12 = scalar_lea.hbm %s2380_s7, 16  ;;  %s2744_s20 = scalar_lea.hbm %s4365_s4, 32 }
 0x2c3   : > { %p2741_p4 = scmp.ne.s32.totalorder %s2380_s7, %s2740_s12  ;;  %p2745_p9 = scmp.lt.s32.totalorder %s2380_s7, %s4365_s4 }
 0x2c4   : > { %p2746_p10 = scmp.lt.s32.totalorder %s2744_s20, %s2740_s12 }
 0x2c5   : > { %p2742_p7 = pnand %p2741_p4, %p2860_p5 }
 0x2c6   : > { %p2747_p11 = por %p2746_p10, %p2745_p9 }
 0x2c7   : > { %p2743_p8 = pneg %p2742_p7 }
 0x2c9   : > { %p2748_p12 = pnand %p2747_p11, %p2743_p8 }
 0x2cb   : > { %2751 = shalt.err (!%p2748_p12)
}
 0x2cc   : > { %2483 = dma.vmem_to_hbm [thread:$0]  (%p2860_p5), %s2383_s30, 16, %s2380_s7, %s2370_s8  }
 0x2cd PF: > { %p2489_p13 = scmp.ge.s32.totalorder %s2786_s18, 2  ;;  %s2394_s27 = sand.u32 1, %s2774_s15  }
 0x2ce   : > { %s2395_s28 = scalar_lea.sflag [#allocation3], %s2394_s27 }
 0x2cf   : > { %p2486_p0 = pnand %p2489_p13, %p2864_p6 }
 0x2d1   : > { %p2487_p1 = pneg %p2486_p0 }
 0x2d3   : > { %2769 = dma.done.wait (%p2487_p1), %s2395_s28, 16  }
 0x2d4   : > { %2771 = vsyncadd (%p2487_p1), %s2395_s28, 4294967280  ;;  %p14_p2 = scmp.ge.s32.totalorder %s2847_s21, 4   ;;  %s4543_s15 = smov %s2778_s16 }
 0x2d5   : > { %s4544_s16 = smov %s2782_s17  ;;  %s4545_s17 = smov %s2858_s24 }
 0x2d6   : > { %s4546_s18 = smov %s2847_s21  ;;  %16 = sbr.rel (!%p14_p2) target bundleno = 3 (0x3), region = 71 }
 0x2db   :  { %2399 = vsyncpa [#allocation3], 1 }
 0x2dc   :  { %2401 = vsyncpa [#allocation3 + $0x1], 1 }

</bundles_post_ra>
